<compile_context>
chip_gen: v5e
topology: v5e:2x2
jax: 0.10.0
libtpu: 0.0.40
codegen_flags: <defaults>
</compile_context>

<pallas_src>
import jax
import jax.numpy as jnp
from jax.experimental import pallas as pl
from jax.experimental.pallas import tpu as pltpu

LANE = 128


def _round_up(x, m):
    return (x + m - 1) // m * m


def _pick_tile_hw(hw, cap=1024):
    """Largest HW tile <= cap that divides HW (whole image if already small)."""
    if hw <= cap:
        return hw
    t = cap
    while t > 8:
        if hw % t == 0:
            return t
        t //= 2
    return hw


# ----------------------------------------------------------------------------
# Fused kernel: [conv_in | hint-conv] as one MXU push, SiLU, zero_conv(1x1),
# skip add.  One (batch, HW-tile) per grid step.
# ----------------------------------------------------------------------------
def _controlnet_branch_kernel(a_ref, skip_ref, w_cat_ref, b_hint_ref,
                              wz_ref, ebz_ref, o_ref):
    # a_ref      : (T, Kp)     bf16   merged im2col [latent taps | hint taps | 0]
    # skip_ref   : (T, Cp)     bf16   UNet skip connection
    # w_cat_ref  : (Kp, 2*Cp)  bf16   block weight: [[W_in, 0], [0, W_hint]]
    # b_hint_ref : (1, Cp)     f32
    # wz_ref     : (Cp, Cp)    bf16   zero-conv (1x1) weight
    # ebz_ref    : (1, Cp)     f32    folded bias (emb + b_in) @ Wz + bz
    # o_ref      : (T, Cp)     bf16
    cp = o_ref.shape[-1]
    # One 256-wide MXU push computes both 3x3 convs (f32 accumulation).
    res = jnp.dot(a_ref[...], w_cat_ref[...],
                  preferred_element_type=jnp.float32)          # (T, 2*Cp)
    h1 = res[:, :cp]                          # conv_in(latent); bias folded into ebz
    h2 = res[:, cp:] + b_hint_ref[...]        # hint conv + bias
    h2 = h2 * jax.nn.sigmoid(h2)              # SiLU in f32 (EUP)
    hs = (h1 + h2).astype(jnp.bfloat16)
    ctrl = jnp.dot(hs, wz_ref[...],
                   preferred_element_type=jnp.float32) + ebz_ref[...]
    o_ref[...] = (skip_ref[...].astype(jnp.float32) + ctrl).astype(o_ref.dtype)


def _fused_control_branch(a, skip_p, w_cat, b_hint_p, wz_p, ebz_p, tile_hw):
    N, HW, Kp = a.shape
    Cp = skip_p.shape[-1]
    grid = (N, HW // tile_hw)

    flops = 2 * N * HW * (Kp * 2 * Cp + Cp * Cp)
    transcendentals = N * HW * Cp                      # sigmoid
    bytes_accessed = int(
        a.size * 2 + skip_p.size * 2 + N * HW * Cp * 2          # bf16 streams
        + w_cat.size * 2 + wz_p.size * 2                        # bf16 weights
        + b_hint_p.size * 4 + ebz_p.size * 4)                   # f32 biases

    return pl.pallas_call(
        _controlnet_branch_kernel,
        out_shape=jax.ShapeDtypeStruct((N, HW, Cp), jnp.bfloat16),
        grid=grid,
        in_specs=[
            pl.BlockSpec((None, tile_hw, Kp), lambda n, t: (n, t, 0)),
            pl.BlockSpec((None, tile_hw, Cp), lambda n, t: (n, t, 0)),
            pl.BlockSpec((Kp, 2 * Cp), lambda n, t: (0, 0)),
            pl.BlockSpec((1, Cp), lambda n, t: (0, 0)),
            pl.BlockSpec((Cp, Cp), lambda n, t: (0, 0)),
            pl.BlockSpec((None, 1, Cp), lambda n, t: (n, 0, 0)),
        ],
        out_specs=pl.BlockSpec((None, tile_hw, Cp), lambda n, t: (n, t, 0)),
        compiler_params=pltpu.CompilerParams(
            dimension_semantics=("parallel", "parallel")),
        cost_estimate=pl.CostEstimate(flops=flops,
                                      transcendentals=transcendentals,
                                      bytes_accessed=bytes_accessed),
    )(a, skip_p, w_cat, b_hint_p, wz_p, ebz_p)


# ----------------------------------------------------------------------------
# One-time layout prep (outside the hot kernel): im2col, merging, channel
# padding, weight block-structuring, bf16 casts.
# ----------------------------------------------------------------------------
def _im2col_3x3(x_nhwc):
    """SAME-padded 3x3 im2col -> (N, H*W, 9*C)."""
    N, H, W, C = x_nhwc.shape
    xp = jnp.pad(x_nhwc, ((0, 0), (1, 1), (1, 1), (0, 0)))
    taps = [xp[:, dy:dy + H, dx:dx + W, :] for dy in range(3) for dx in range(3)]
    return jnp.concatenate(taps, axis=-1).reshape(N, H * W, 9 * C)


def _conv_w_to_mat(w_oihw):
    """(Cout, Cin, 3, 3) -> (9*Cin, Cout) matmul weight (tap-major rows)."""
    cout, cin, kh, kw = w_oihw.shape
    return jnp.transpose(w_oihw, (2, 3, 1, 0)).reshape(kh * kw * cin, cout)


def timestep_embedding(t, dim):
    half = dim // 2
    freqs = jnp.exp(-jnp.log(10000.0) * jnp.arange(half, dtype=jnp.float32) / half)
    args = t.astype(jnp.float32)[:, None] * freqs[None, :]
    return jnp.concatenate([jnp.cos(args), jnp.sin(args)], axis=-1)


def init_params(key, c_latent, c_hint, c_model, t_dim, t_hidden):
    ks = jax.random.split(key, 8)
    s = 0.05
    # PyTorch conv weight layout (Cout, Cin, kH, kW).
    w_in = jax.random.normal(ks[0], (c_model, c_latent, 3, 3), jnp.float32) * s
    b_in = jax.random.normal(ks[1], (c_model,), jnp.float32) * s
    w_hint = jax.random.normal(ks[2], (c_model, c_hint, 3, 3), jnp.float32) * s
    b_hint = jax.random.normal(ks[3], (c_model,), jnp.float32) * s
    w1 = jax.random.normal(ks[4], (t_dim, t_hidden), jnp.float32) * s
    b1 = jnp.zeros((t_hidden,), jnp.float32)
    w2 = jax.random.normal(ks[5], (t_hidden, c_model), jnp.float32) * s
    b2 = jnp.zeros((c_model,), jnp.float32)
    # TODO(synk): real ControlNet zero_convs are zero-initialized; use a small
    # nonzero deterministic init here so the kernel test is numerically meaningful.
    wz = jax.random.normal(ks[6], (c_model, c_model), jnp.float32) * s
    bz = jax.random.normal(ks[7], (c_model,), jnp.float32) * s
    return dict(w_in=w_in, b_in=b_in, w_hint=w_hint, b_hint=b_hint,
                w1=w1, b1=b1, w2=w2, b2=b2, wz=wz, bz=bz)


# ----------------------------------------------------------------------------
# Perf-oriented entry: NHWC in, cropped NHWC bf16 out (single channel slice).
# Downstream consumers that accept the padded lane-dense layout should take
# the pallas output directly and skip even this crop.
# ----------------------------------------------------------------------------
def controlnet_forward_nhwc(latent_nhwc, hint_nhwc, timesteps, skip_nhwc, p):
    N, H, W, c_lat = latent_nhwc.shape
    c_hint = hint_nhwc.shape[-1]
    C = p["b_in"].shape[0]
    HW = H * W
    Cp = _round_up(C, LANE)
    K_lat, K_hint = 9 * c_lat, 9 * c_hint
    K_merged = K_lat + K_hint
    Kp = _round_up(K_merged, LANE)
    tile_hw = _pick_tile_hw(HW)

    # Merged im2col LHS: [latent taps | hint taps | zero pad]  (one shared DMA stream).
    a = jnp.concatenate([_im2col_3x3(latent_nhwc), _im2col_3x3(hint_nhwc)], axis=-1)
    a = jnp.pad(a, ((0, 0), (0, 0), (0, Kp - K_merged))).astype(jnp.bfloat16)

    # Skip connection in bf16 (accumulation stays f32 inside the kernel).
    skip_p = jnp.pad(skip_nhwc.reshape(N, HW, C),
                     ((0, 0), (0, 0), (0, Cp - C))).astype(jnp.bfloat16)

    # Block-structured weight (Kp, 2*Cp): [[W_in, 0], [0, W_hint]]; one MXU push
    # yields both conv results side by side (zero rows/cols keep results exact).
    w_in_m = jnp.pad(_conv_w_to_mat(p["w_in"]), ((0, 0), (0, Cp - C)))
    w_hint_m = jnp.pad(_conv_w_to_mat(p["w_hint"]), ((0, 0), (0, Cp - C)))
    top = jnp.concatenate([w_in_m, jnp.zeros((K_lat, Cp), jnp.float32)], axis=1)
    bot = jnp.concatenate([jnp.zeros((K_hint, Cp), jnp.float32), w_hint_m], axis=1)
    w_cat = jnp.concatenate([top, bot], axis=0)
    w_cat = jnp.pad(w_cat, ((0, Kp - K_merged), (0, 0))).astype(jnp.bfloat16)

    b_hint_p = jnp.pad(p["b_hint"], (0, Cp - C)).reshape(1, Cp).astype(jnp.float32)
    wz_p = jnp.pad(p["wz"], ((0, Cp - C), (0, Cp - C))).astype(jnp.bfloat16)

    # Timestep-embedding MLP: below MXU granularity -> left to XLA; its
    # broadcast-add AND conv_in's bias are folded exactly into the zero-conv bias:
    #   (h_nobias + b_in + emb) @ Wz + bz == h_nobias @ Wz + ((emb + b_in) @ Wz + bz)
    t_emb = timestep_embedding(timesteps, p["w1"].shape[0])
    e = t_emb @ p["w1"] + p["b1"]
    e = e * jax.nn.sigmoid(e)
    emb = e @ p["w2"] + p["b2"]
    ebz = (emb + p["b_in"]) @ p["wz"] + p["bz"]                        # (N, C)
    ebz_p = jnp.pad(ebz, ((0, 0), (0, Cp - C))).reshape(N, 1, Cp).astype(jnp.float32)

    out = _fused_control_branch(a, skip_p, w_cat, b_hint_p, wz_p, ebz_p, tile_hw)
    return out[:, :, :C].reshape(N, H, W, C)                           # NHWC bf16


# PyTorch-convention wrapper: NCHW f32 in / out (layout conversion only).
def controlnet_forward(latent_nchw, hint_nchw, timesteps, skip_nchw, p):
    x = jnp.transpose(latent_nchw, (0, 2, 3, 1))
    hint = jnp.transpose(hint_nchw, (0, 2, 3, 1))
    skip = jnp.transpose(skip_nchw, (0, 2, 3, 1))
    out = controlnet_forward_nhwc(x, hint, timesteps, skip, p)
    return jnp.transpose(out, (0, 3, 1, 2)).astype(jnp.float32)


# ----------------------------------------------------------------------------
# Pure-JAX f32 reference (lax.conv) for correctness checking.
# ----------------------------------------------------------------------------
def controlnet_forward_ref(latent_nchw, hint_nchw, timesteps, skip_nchw, p):
    x = jnp.transpose(latent_nchw, (0, 2, 3, 1))
    hint = jnp.transpose(hint_nchw, (0, 2, 3, 1))
    skip = jnp.transpose(skip_nchw, (0, 2, 3, 1))
    dn = ("NHWC", "HWIO", "NHWC")

    def conv(xx, w_oihw, b):
        w = jnp.transpose(w_oihw, (2, 3, 1, 0))
        return jax.lax.conv_general_dilated(xx, w, (1, 1), "SAME",
                                            dimension_numbers=dn) + b

    t_emb = timestep_embedding(timesteps, p["w1"].shape[0])
    e = t_emb @ p["w1"] + p["b1"]
    e = jax.nn.silu(e)
    emb = e @ p["w2"] + p["b2"]

    h = conv(x, p["w_in"], p["b_in"])
    gh = jax.nn.silu(conv(hint, p["w_hint"], p["b_hint"]))
    hs = h + gh + emb[:, None, None, :]
    ctrl = jnp.einsum("nhwc,cd->nhwd", hs, p["wz"]) + p["bz"]
    return jnp.transpose(skip + ctrl, (0, 3, 1, 2))


if __name__ == "__main__":
    key = jax.random.PRNGKey(0)
    N, H, W = 2, 16, 16
    C_LATENT, C_HINT, C_MODEL = 4, 3, 32
    T_DIM, T_HIDDEN = 32, 64

    k1, k2, k3, k4, kp = jax.random.split(key, 5)
    latent = jax.random.normal(k1, (N, C_LATENT, H, W), jnp.float32)
    hint = jax.random.normal(k2, (N, C_HINT, H, W), jnp.float32)
    skip = jax.random.normal(k3, (N, C_MODEL, H, W), jnp.float32)
    timesteps = jax.random.randint(k4, (N,), 0, 1000)
    params = init_params(kp, C_LATENT, C_HINT, C_MODEL, T_DIM, T_HIDDEN)

    out = controlnet_forward(latent, hint, timesteps, skip, params)
    out = jax.block_until_ready(out)

    ref = controlnet_forward_ref(latent, hint, timesteps, skip, params)
    assert out.shape == (N, C_MODEL, H, W)
    # bf16 matmul operands / bf16 skip+output storage (f32 accumulation inside)
    # vs. pure-f32 reference -> looser tolerance.
    assert jnp.allclose(out, ref, atol=5e-2, rtol=5e-2), "mismatch vs reference"
    print("KERNEL_OK")
</pallas_src>

<mosaic_0001>
module attributes {stable_mosaic.version = 11 : i64} {
  func.func @_controlnet_branch_kernel(%arg0: i32, %arg1: i32, %arg2: memref<1x256x128xbf16, #tpu.memory_space<vmem>>, %arg3: memref<1x256x128xbf16, #tpu.memory_space<vmem>>, %arg4: memref<128x256xbf16, #tpu.memory_space<vmem>>, %arg5: memref<1x128xf32, #tpu.memory_space<vmem>>, %arg6: memref<128x128xbf16, #tpu.memory_space<vmem>>, %arg7: memref<1x1x128xf32, #tpu.memory_space<vmem>>, %arg8: memref<1x256x128xbf16, #tpu.memory_space<vmem>>) attributes {dimension_semantics = [#tpu.dimension_semantics<parallel>, #tpu.dimension_semantics<parallel>], iteration_bounds = array<i64: 2, 1>, scalar_prefetch = 0 : i64, scratch_operands = 0 : i64, tpu.core_type = #tpu.core_type<tc>, window_params = [{transform_indices = @transform_0, window_bounds = array<i64: 1, 256, 128>}, {transform_indices = @transform_1, window_bounds = array<i64: 1, 256, 128>}, {pipeline_mode = #tpu.pipeline_mode<synchronous>, transform_indices = @transform_2, window_bounds = array<i64: 128, 256>}, {pipeline_mode = #tpu.pipeline_mode<synchronous>, transform_indices = @transform_3, window_bounds = array<i64: 1, 128>}, {pipeline_mode = #tpu.pipeline_mode<synchronous>, transform_indices = @transform_4, window_bounds = array<i64: 128, 128>}, {transform_indices = @transform_5, window_bounds = array<i64: 1, 1, 128>}, {transform_indices = @transform_6, window_bounds = array<i64: 1, 256, 128>}]} {
    %c0 = arith.constant 0 : index
    %c0_0 = arith.constant 0 : index
    %c0_1 = arith.constant 0 : index
    %0 = vector.load %arg2[%c0, %c0_0, %c0_1] : memref<1x256x128xbf16, #tpu.memory_space<vmem>>, vector<1x256x128xbf16>
    %1 = vector.shape_cast %0 : vector<1x256x128xbf16> to vector<256x128xbf16>
    %c0_2 = arith.constant 0 : index
    %c0_3 = arith.constant 0 : index
    %2 = vector.load %arg4[%c0_2, %c0_3] : memref<128x256xbf16, #tpu.memory_space<vmem>>, vector<128x256xbf16>
    %cst = arith.constant dense<0.000000e+00> : vector<256x256xf32>
    %3 = tpu.matmul %1, %2, %cst {dimension_numbers = #tpu.dot_dimension_numbers<[1], [0], [0], [1], [0, 0, 1, 1], [], []>} : vector<256x128xbf16>, vector<128x256xbf16>, vector<256x256xf32> -> vector<256x256xf32>
    %4 = vector.extract_strided_slice %3 {offsets = [0, 0], sizes = [256, 128], strides = [1, 1]} : vector<256x256xf32> to vector<256x128xf32>
    %5 = vector.extract_strided_slice %3 {offsets = [0, 128], sizes = [256, 128], strides = [1, 1]} : vector<256x256xf32> to vector<256x128xf32>
    %c0_4 = arith.constant 0 : index
    %c0_5 = arith.constant 0 : index
    %6 = vector.load %arg5[%c0_4, %c0_5] : memref<1x128xf32, #tpu.memory_space<vmem>>, vector<1x128xf32>
    %7 = vector.broadcast %6 : vector<1x128xf32> to vector<256x128xf32>
    %8 = arith.addf %5, %7 : vector<256x128xf32>
    %9 = arith.negf %8 : vector<256x128xf32>
    %10 = math.exp %9 : vector<256x128xf32>
    %cst_6 = arith.constant 1.000000e+00 : f32
    %11 = vector.broadcast %cst_6 : f32 to vector<256x128xf32>
    %12 = arith.addf %11, %10 : vector<256x128xf32>
    %13 = arith.divf %11, %12 : vector<256x128xf32>
    %14 = arith.mulf %8, %13 : vector<256x128xf32>
    %15 = arith.addf %4, %14 : vector<256x128xf32>
    %16 = arith.truncf %15 : vector<256x128xf32> to vector<256x128xbf16>
    %c0_7 = arith.constant 0 : index
    %c0_8 = arith.constant 0 : index
    %17 = vector.load %arg6[%c0_7, %c0_8] : memref<128x128xbf16, #tpu.memory_space<vmem>>, vector<128x128xbf16>
    %cst_9 = arith.constant dense<0.000000e+00> : vector<256x128xf32>
    %18 = tpu.matmul %16, %17, %cst_9 {dimension_numbers = #tpu.dot_dimension_numbers<[1], [0], [0], [1], [0, 0, 1, 1], [], []>} : vector<256x128xbf16>, vector<128x128xbf16>, vector<256x128xf32> -> vector<256x128xf32>
    %c0_10 = arith.constant 0 : index
    %c0_11 = arith.constant 0 : index
    %c0_12 = arith.constant 0 : index
    %19 = vector.load %arg7[%c0_10, %c0_11, %c0_12] : memref<1x1x128xf32, #tpu.memory_space<vmem>>, vector<1x1x128xf32>
    %20 = vector.shape_cast %19 : vector<1x1x128xf32> to vector<1x128xf32>
    %21 = vector.broadcast %20 : vector<1x128xf32> to vector<256x128xf32>
    %22 = arith.addf %18, %21 : vector<256x128xf32>
    %c0_13 = arith.constant 0 : index
    %c0_14 = arith.constant 0 : index
    %c0_15 = arith.constant 0 : index
    %23 = vector.load %arg3[%c0_13, %c0_14, %c0_15] : memref<1x256x128xbf16, #tpu.memory_space<vmem>>, vector<1x256x128xbf16>
    %24 = vector.shape_cast %23 : vector<1x256x128xbf16> to vector<256x128xbf16>
    %25 = arith.extf %24 : vector<256x128xbf16> to vector<256x128xf32>
    %26 = arith.addf %25, %22 : vector<256x128xf32>
    %27 = arith.truncf %26 : vector<256x128xf32> to vector<256x128xbf16>
    %c0_16 = arith.constant 0 : index
    %c0_17 = arith.constant 0 : index
    %c0_18 = arith.constant 0 : index
    %28 = vector.load %arg8[%c0_16, %c0_17, %c0_18] : memref<1x256x128xbf16, #tpu.memory_space<vmem>>, vector<1x256x128xbf16>
    %29 = vector.shape_cast %28 : vector<1x256x128xbf16> to vector<256x128xbf16>
    %30 = vector.shape_cast %27 : vector<256x128xbf16> to vector<1x256x128xbf16>
    tpu.vector_store %arg8[%c0_16, %c0_17, %c0_18], %30 {strides = array<i32>} : memref<1x256x128xbf16, #tpu.memory_space<vmem>>, vector<1x256x128xbf16>,
    return
  }
  func.func @transform_0(%arg0: i32, %arg1: i32) -> (i32, i32, i32) {
    %c0_i32 = arith.constant 0 : i32
    %c0_i32_0 = arith.constant 0 : i32
    return %arg0, %arg1, %c0_i32 : i32, i32, i32
  }
  func.func @transform_1(%arg0: i32, %arg1: i32) -> (i32, i32, i32) {
    %c0_i32 = arith.constant 0 : i32
    %c0_i32_0 = arith.constant 0 : i32
    return %arg0, %arg1, %c0_i32 : i32, i32, i32
  }
  func.func @transform_2(%arg0: i32, %arg1: i32) -> (i32, i32) {
    %c0_i32 = arith.constant 0 : i32
    %c0_i32_0 = arith.constant 0 : i32
    %c0_i32_1 = arith.constant 0 : i32
    return %c0_i32, %c0_i32_0 : i32, i32
  }
  func.func @transform_3(%arg0: i32, %arg1: i32) -> (i32, i32) {
    %c0_i32 = arith.constant 0 : i32
    %c0_i32_0 = arith.constant 0 : i32
    %c0_i32_1 = arith.constant 0 : i32
    return %c0_i32, %c0_i32_0 : i32, i32
  }
  func.func @transform_4(%arg0: i32, %arg1: i32) -> (i32, i32) {
    %c0_i32 = arith.constant 0 : i32
    %c0_i32_0 = arith.constant 0 : i32
    %c0_i32_1 = arith.constant 0 : i32
    return %c0_i32, %c0_i32_0 : i32, i32
  }
  func.func @transform_5(%arg0: i32, %arg1: i32) -> (i32, i32, i32) {
    %c0_i32 = arith.constant 0 : i32
    %c0_i32_0 = arith.constant 0 : i32
    %c0_i32_1 = arith.constant 0 : i32
    return %arg0, %c0_i32, %c0_i32_0 : i32, i32, i32
  }
  func.func @transform_6(%arg0: i32, %arg1: i32) -> (i32, i32, i32) {
    %c0_i32 = arith.constant 0 : i32
    %c0_i32_0 = arith.constant 0 : i32
    return %arg0, %arg1, %c0_i32 : i32, i32, i32
  }
}

</mosaic_0001>

<bundles_post_ra>
// kernel: tpu_custom_call.1
= control target key start
LH: loop header
LB: loop body
LE: loop exit
PB: predicated region body
PF: predicated region fallthrough
CT: control target
= control target key end

     0   :  { %s3993_s0 = inlined_call_operand.hbm [shape: bf16[2,256,128], index: 0, kind: input, shape index: {}]   ;;  %s3994_s1 = inlined_call_operand.hbm [shape: bf16[2,256,128], index: 1, kind: input, shape index: {}]   ;;  %s3995_s2 = inlined_call_operand.hbm [shape: bf16[128,256], index: 2, kind: input, shape index: {}]   ;;  %s3996_s3 = inlined_call_operand.vmem [shape: f32[1,128], index: 3, kind: input, shape index: {}]   ;;  %s3997_s4 = inlined_call_operand.hbm [shape: bf16[128,128], index: 4, kind: input, shape index: {}]   ;;  %s3998_s5 = inlined_call_operand.vmem [shape: f32[2,1,128], index: 5, kind: input, shape index: {}]   ;;  %s3999_s6 = inlined_call_operand.hbm [shape: bf16[2,256,128], index: 6, kind: output, shape index: {}]  }
   0x1   :  { %4008 = sst [smem:[#allocation21_spill]] %s3995_s2 }
   0x2   :  { %4009 = sst [smem:[#allocation22_spill]] %s3997_s4 }
   0x3   :  { %11 = vsyncpa [#allocation3], 0 }
   0x4   :  { %13 = vsyncpa [#allocation3 + $0x1], 0 }
   0x5   :  { %14 = vsyncpa [#allocation6], 0 }
   0x6   :  { %16 = vsyncpa [#allocation6 + $0x1], 0 }
   0x7   :  { %17 = vsyncpa [#allocation9], 0 }
   0x8   :  { %18 = vsyncpa [#allocation4], 0 }
   0x9   :  { %20 = vsyncpa [#allocation4 + $0x1], 0  ;;  %s2928_s21 = smov 0   ;;  %s2930_s22 = smov 0  }
   0xa   :  { %s2932_s23 = smov 0   ;;  %s2934_s24 = smov 0  }
   0xb   :  { %s2936_s25 = smov 0   ;;  %s2938_s26 = smov 0  }
   0xc LB: > { %4010 = sst [smem:[#allocation16_spill]] %s2871_s23  ;;  %s2959_s27 = sadd.s32 4294967295, %s2883_s26   ;;  %s2883_s26 = sphi %s2938_s26, %s26_s26   ;;  %s2879_s25 = sphi %s2936_s25, %s4086_s25   ;;  %s2875_s24 = sphi %s2934_s24, %s4085_s24   ;;  %s2871_s23 = sphi %s2932_s23, %s4084_s23   ;;  %s2867_s22 = sphi %s2930_s22, %s4088_s22   ;;  %s2863_s21 = sphi %s2928_s21, %s4087_s21  }
   0xd   : > { %4011 = sst [smem:[#allocation17_spill]] %s2879_s25  ;;  %s1989_s28 = sadd.s32 4294967294, %s2883_s26  }
   0xe   : > { %p60_p0 = scmp.ne.s32.totalorder %s2867_s22, %s2863_s21  ;;  %p61_p1 = scmp.eq.s32.totalorder %s2959_s27, 0 }
   0xf   : > { %p203_p2 = scmp.eq.s32.totalorder %s2959_s27, 1  ;;  %p209_p3 = scmp.eq.s32.totalorder %s1989_s28, 1 }
  0x10   : > { %p2968_p4 = por %p61_p1, %p60_p0  ;;  %p1990_p5 = scmp.ge.s32.totalorder %s2883_s26, 1 }
  0x11   : > { %p2973_p6 = por %p209_p3, %p60_p0  ;;  %p216_p7 = scmp.lt.s32.totalorder %s2883_s26, 3 }
  0x12   : > { %s4015_s2 = sld [smem:[#allocation21_spill]]  ;;  %s2885_s11 = smov [#allocation7]  }
  0x13   : > { %s4013_s30 = scalar_select %p2973_p6, 1, 0 }
  0x14   : > { %p2981_p8 = pnand %p1990_p5, %p216_p7  ;;  %s229_s12 = sshll.u32 %s2885_s11, 4  ;;  %s230_s12 = int_to_ptr.vmem [resolvable:$true] %s229_s12 }
  0x15   : > { %4014 = sst [smem:[#allocation18_spill]] %s4013_s30  ;;  %p1993_p11 = scmp.ge.s32.totalorder %s2883_s26, 2 }
  0x16   : > { %p2458_p9 = pneg %p2981_p8  ;;  %s4017_s4 = sld [smem:[#allocation22_spill]] }
  0x17   : > { %s2886_s16 = smov 128   ;;  %s2887_s17 = smov 8  }
  0x18   : > { %s227_s9 = sshll.u32 %s4015_s2, 4  ;;  %p2459_p10 = pnand %p2458_p9, %p61_p1  ;;  %s228_s9 = int_to_ptr.hbm [resolvable:$true] %s227_s9 }
  0x19   : > { %s2888_s18 = smov [#allocation8]   ;;  %s4000_s20 = smov 64  }
  0x1a   : > { %2461 = dma.hbm_to_vmem [thread:$0]  (!%p2459_p10), %s228_s9, 2048, %s230_s12, [#allocation6], %s2886_s16, %s2886_s16, %s2887_s17  }
  0x1b   : > { %s246_s19 = sshll.u32 %s2888_s18, 4  ;;  %s4002_s28 = smov 4   ;;  %s247_s19 = int_to_ptr.vmem [resolvable:$true] %s246_s19 }
  0x1c   : > { %s244_s15 = sshll.u32 %s4017_s4, 4  ;;  %s38_s7 = sadd.s32 1, %s2879_s25  ;;  %s245_s15 = int_to_ptr.hbm [resolvable:$true] %s244_s15 }
  0x1d   : > { %2464 = dma.hbm_to_vmem [thread:$0]  (!%p2459_p10), %s245_s15, 1024, %s247_s19, [#allocation9], %s4000_s20, %s4000_s20, %s4002_s28  }
  0x1e   : > { %s47_s8 = sadd.s32 1, %s2871_s23  ;;  %p40_p12 = scmp.ge.s32.totalorder %s38_s7, 2 }
  0x1f   : > { %p54_p13 = scmp.ne.s32.totalorder %s2871_s23, %s2867_s22  ;;  %p55_p0 = scmp.eq.s32.totalorder %s2883_s26, 0 }
  0x20   : > { %p2478_p3 = scmp.lt.s32.totalorder %s2883_s26, 2  ;;  %s4090_s7 = smov (%p40_p12, %s38_s7), 0 }
  0x21   : > { %4018 = sst [smem:[#allocation19_spill]] %s4090_s7  ;;  %p3004_p5 = por %p55_p0, %p54_p13 }
  0x22   : > { %p3010_p7 = por %p203_p2, %p54_p13  ;;  %s42_s12 = ssub.s32 %s2879_s25, %s4090_s7 }
  0x23   : > { %s260_s13 = sand.u32 1, %s2871_s23   ;;  %p45_p9 = scmp.eq.s32.totalorder %s42_s12, 0 }
  0x24   : > { %s1994_s14 = sshll.u32 %s260_s13, 7  ;;  %s2203_s15 = sshll.u32 %s2879_s25, 7 }
  0x25   : > { %s3019_s16 = scalar_select %p45_p9, %s2871_s23, %s47_s8  }
  0x26   : > { %s271_s19 = scalar_lea.hbm %s3993_s0, %s2203_s15  ;;  %s264_s28 = scalar_lea.vmem [#allocation2], %s1994_s14 }
  0x27   : > { %4021 = sst [smem:[#allocation20_spill]] %s3019_s16  ;;  %s272_s20 = sshll.u32 %s271_s19, 4  ;;  %s273_s20 = int_to_ptr.hbm [resolvable:$true] %s272_s20 }
  0x28   : > { %s274_s2 = sshll.u32 %s264_s28, 4  ;;  %p2466_p2 = pnand %p2478_p3, %p3004_p5  ;;  %s275_s2 = int_to_ptr.vmem [resolvable:$true] %s274_s2 }
  0x29   : > { %s295_s12 = scalar_lea.hbm %s3994_s1, %s2203_s15  ;;  %s288_s25 = scalar_lea.vmem [#allocation5], %s1994_s14 }
  0x2a   : > { %s298_s8 = sshll.u32 %s288_s25, 4  ;;  %s296_s16 = sshll.u32 %s295_s12, 4  ;;  %s297_s16 = int_to_ptr.hbm [resolvable:$true] %s296_s16  ;;  %s299_s8 = int_to_ptr.vmem [resolvable:$true] %s298_s8 }
  0x2b   : > { %s261_s23 = scalar_lea.sflag [#allocation3], %s260_s13  ;;  %s4022_s30 = smov 4  }
  0x2c   : > { %s4023_s17 = smov 64   ;;  %s284_s28 = sand.u32 1, %s2883_s26  }
  0x2d   : > { %2468 = dma.hbm_to_vmem [thread:$0]  (!%p2466_p2), %s273_s20, 2048, %s275_s2, %s261_s23, %s4023_s17, %s4023_s17, %s4022_s30  }
  0x2e   : > { %s285_s18 = scalar_lea.sflag [#allocation6], %s284_s28  ;;  %316 = sbr.rel (%p2981_p8) target bundleno = 600 (0x258), region = 44 }
  0x2f   : > { %2471 = dma.hbm_to_vmem [thread:$0]  (!%p2466_p2), %s297_s16, 2048, %s299_s8, %s285_s18, %s4023_s17, %s4023_s17, %s4022_s30  }
  0x30   : > { %s3041_s4 = sand.u32 (!%p2981_p8), 1, %s2867_s22  }
  0x31   : > { %s3044_s25 = sshll.u32 (!%p2981_p8), %s3041_s4, 7  ;;  %s319_s2 = scalar_lea.sflag (!%p2981_p8), [#allocation3], %s3041_s4 }
  0x32   : > { %s3048_s23 = scalar_lea.vmem (!%p2981_p8), [#allocation2], %s3044_s25 }
  0x33   : > { %2842 = dma.done.wait (%p2968_p4), %s319_s2, 2048  }
  0x34   : > { %2844 = vsyncadd (%p2968_p4), %s319_s2, 4294965248  ;;  %s328_s30 = sand.u32 1, %s2959_s27   ;;  %s3056_s20 = scalar_lea.vmem [#allocation5], %s3044_s25 }
  0x35   : > { %s329_s10 = scalar_lea.sflag [#allocation6], %s328_s30 }
  0x36   : > { %2846 = dma.done.wait (%p2968_p4), %s329_s10, 2048  }
  0x37   : > { %2848 = vsyncadd (%p2968_p4), %s329_s10, 4294965248 }
  0x38   : > { %2850 = dma.done.wait (%p61_p1), [#allocation6], 2048  }
  0x39   : > { %2852 = vsyncadd (%p61_p1), [#allocation6], 4294965248 }
  0x3a   : > { %2854 = dma.done.wait (%p61_p1), [#allocation9], 1024  }
  0x3b   : > { %2856 = vsyncadd (%p61_p1), [#allocation9], 4294966272  ;;  %v2128_v0 = vld [vmem:[#allocation7 + $0x70] sm:$0xf]  ;;  %v2236_v1 = vld [vmem:[#allocation7 + $0x74] sm:$0xf0] }
  0x3c   : > { %v2235_v2 = vld [vmem:[#allocation7 + $0x74] sm:$0xf]  ;;  %v2129_v3 = vor.u32 %v2236_v1, %v2128_v0  ;;  %v2130_v4 = vld [vmem:[#allocation7 + $0x78] sm:$0xf0]  ;;  %v2120_v5 = vld [vmem:[#allocation7 + $0x60] sm:$0xf] }
  0x3d   : > { %v2234_v6 = vld [vmem:[#allocation7 + $0x64] sm:$0xf0]  ;;  %v3070_v7 = vor.u32 %v2235_v2, %v2130_v4  ;;  %v2233_v8 = vld [vmem:[#allocation7 + $0x64] sm:$0xf]  ;;  %v2122_v9 = vld [vmem:[#allocation7 + $0x68] sm:$0xf0] }
  0x3e   : > { %2420 = vmatpush.bf16.msra.mxu3 %v2129_v3  ;;  %v2121_v10 = vor.u32 %v2234_v6, %v2120_v5  ;;  %610 = vmatpush.bf16.msra.mxu0 %v2129_v3  ;;  %v3073_v11 = vor.u32 %v2233_v8, %v2122_v9  ;;  %v2112_v12 = vld [vmem:[#allocation7 + $0x50] sm:$0xf]  ;;  %v2232_v13 = vld [vmem:[#allocation7 + $0x54] sm:$0xf0]  ;;  %v2231_v14 = vld [vmem:[#allocation7 + $0x54] sm:$0xf] }
  0x3f   : > { %699 = vmatpush.bf16.msra.mxu1 %v3070_v7  ;;  %v2114_v15 = vld [vmem:[#allocation7 + $0x58] sm:$0xf0]  ;;  %v2113_v16 = vor.u32 %v2232_v13, %v2112_v12  ;;  %v2104_v18 = vld [vmem:[#allocation7 + $0x40] sm:$0xf]  ;;  %v2230_v19 = vld [vmem:[#allocation7 + $0x44] sm:$0xf0] }
  0x40   : > { %v2117_v17 = vor.u32 %v2231_v14, %v2114_v15  ;;  %v2229_v20 = vld [vmem:[#allocation7 + $0x44] sm:$0xf]  ;;  %v2106_v21 = vld [vmem:[#allocation7 + $0x48] sm:$0xf0]  ;;  %v2105_v22 = vor.u32 %v2230_v19, %v2104_v18  ;;  %v2096_v24 = vld [vmem:[#allocation7 + $0x30] sm:$0xf] }
  0x41   : > { %v2109_v23 = vor.u32 %v2229_v20, %v2106_v21  ;;  %v2228_v25 = vld [vmem:[#allocation7 + $0x34] sm:$0xf0]  ;;  %v2227_v26 = vld [vmem:[#allocation7 + $0x34] sm:$0xf]  ;;  %v2098_v27 = vld [vmem:[#allocation7 + $0x38] sm:$0xf0] }
  0x42   : > { %2421 = vmatpush.bf16.msra.mxu3 %v2121_v10  ;;  %611 = vmatpush.bf16.msra.mxu0 %v2121_v10  ;;  %v2097_v28 = vor.u32 %v2228_v25, %v2096_v24  ;;  %v2101_v29 = vor.u32 %v2227_v26, %v2098_v27  ;;  %v2088_v30 = vld [vmem:[#allocation7 + $0x20] sm:$0xf]  ;;  %v2226_v31 = vld [vmem:[#allocation7 + $0x24] sm:$0xf0]  ;;  %v2225_v32 = vld [vmem:[#allocation7 + $0x24] sm:$0xf] }
  0x43   : > { %700 = vmatpush.bf16.msra.mxu1 %v3073_v11  ;;  %v2090_v33 = vld [vmem:[#allocation7 + $0x28] sm:$0xf0]  ;;  %v2089_v34 = vor.u32 %v2226_v31, %v2088_v30  ;;  %v2080_v36 = vld [vmem:[#allocation7 + $0x10] sm:$0xf]  ;;  %v2224_v37 = vld [vmem:[#allocation7 + $0x14] sm:$0xf0] }
  0x44   : > { %v2093_v35 = vor.u32 %v2225_v32, %v2090_v33  ;;  %v2223_v38 = vld [vmem:[#allocation7 + $0x14] sm:$0xf]  ;;  %v2082_v39 = vld [vmem:[#allocation7 + $0x18] sm:$0xf0]  ;;  %v2081_v40 = vor.u32 %v2224_v37, %v2080_v36  ;;  %v2072_v42 = vld [vmem:[#allocation7] sm:$0xf] }
  0x45   : > { %v2085_v41 = vor.u32 %v2223_v38, %v2082_v39  ;;  %v2222_v43 = vld [vmem:[#allocation7 + $0x4] sm:$0xf0]  ;;  %v2221_v44 = vld [vmem:[#allocation7 + $0x4] sm:$0xf]  ;;  %v2074_v45 = vld [vmem:[#allocation7 + $0x8] sm:$0xf0] }
  0x46   : > { %2422 = vmatpush.bf16.msra.mxu3 %v2113_v16  ;;  %612 = vmatpush.bf16.msra.mxu0 %v2113_v16  ;;  %v2073_v46 = vor.u32 %v2222_v43, %v2072_v42  ;;  %v2077_v47 = vor.u32 %v2221_v44, %v2074_v45  ;;  %v2217_v48 = vld [vmem:[%s3048_s23 + $0x60] sm:$0xff]  ;;  %v2218_v50 = vld [vmem:[%s3048_s23 + $0x68] sm:$0xff]  ;;  %v2219_v52 = vld [vmem:[%s3048_s23 + $0x70] sm:$0xff]  ;;  %p382_p1 = scmp.lt.s32.totalorder %s2875_s24, 1  ;;  %s3845_s8 = scalar_lea.vmem [#allocation10], %s3044_s25 }
  0x47   : > { %701 = vmatpush.bf16.msra.mxu1 %v2117_v17  ;;  %v2205_v49 = vld [vmem:[%s3048_s23] sm:$0xff]  ;;  %v2206_v51 = vld [vmem:[%s3048_s23 + $0x8] sm:$0xff]  ;;  %v2207_v53 = vld [vmem:[%s3048_s23 + $0x10] sm:$0xff]  ;;  %s2245_s17 = sshll.u32 %s2875_s24, 7  ;;  %s1844_s2 = sshll.u32 %s3845_s8, 4  ;;  %s1845_s2 = int_to_ptr.vmem [resolvable:$true] %s1844_s2 }
  0x48   : > { %v2220_v54 = vld [vmem:[%s3048_s23 + $0x78] sm:$0xff]  ;;  %v2209_v56 = vld [vmem:[%s3048_s23 + $0x20] sm:$0xff]  ;;  %v2210_v57 = vld [vmem:[%s3048_s23 + $0x28] sm:$0xff]  ;;  %s3196_s7 = scalar_select %p382_p1, %s2875_s24, 1 }
  0x49   : > { %v2208_v55 = vld [vmem:[%s3048_s23 + $0x18] sm:$0xff]  ;;  %v2211_v58 = vld [vmem:[%s3048_s23 + $0x30] sm:$0xff]  ;;  %v2242_v62 = vld [vmem:[#allocation8 + $0x28] sm:$0xff]  ;;  %s1843_s25 = scalar_lea.hbm %s3999_s6, %s2245_s17  ;;  %s1830_s24 = scalar_lea.sflag [#allocation4], %s3041_s4 }
  0x4a   : > { %2423 = vmatpush.bf16.msra.mxu3 %v2105_v22  ;;  %613 = vmatpush.bf16.msra.mxu0 %v2105_v22  ;;  %v2244_v59 = vld [vmem:[#allocation8 + $0x38] sm:$0xff]  ;;  %v2243_v61 = vld [vmem:[#allocation8 + $0x30] sm:$0xff]  ;;  %v2241_v63 = vld [vmem:[#allocation8 + $0x20] sm:$0xff]  ;;  %s384_s14 = scalar_lea.vmem %s3998_s5, %s3196_s7  ;;  %s2809_s29 = scalar_lea.hbm %s3999_s6, 256 }
  0x4b   : > { %702 = vmatpush.bf16.msra.mxu1 %v2109_v23  ;;  %1580 = vmatpush.bf16.msra.mxu2 %v2244_v59  ;;  %v2212_v60 = vld [vmem:[%s3048_s23 + $0x38] sm:$0xff]  ;;  %v3093_v1 = vld [vmem:[%s3996_s3] ss:$0 sm:$0xff]  ;;  %v2239_v5 = vld [vmem:[#allocation8 + $0x10] sm:$0xff] }
  0x4c   : > { %v2240_v0 = vld [vmem:[#allocation8 + $0x18] sm:$0xff]  ;;  %v2213_v2 = vld [vmem:[%s3048_s23 + $0x40] sm:$0xff]  ;;  %v2238_v8 = vld [vmem:[#allocation8 + $0x8] sm:$0xff] }
  0x4d   : > { %v2237_v13 = vld [vmem:[#allocation8] sm:$0xff]  ;;  %v2214_v18 = vld [vmem:[%s3048_s23 + $0x48] sm:$0xff]  ;;  %v2215_v44 = vld [vmem:[%s3048_s23 + $0x50] sm:$0xff] }
  0x4e   : > { %2424 = vmatpush.bf16.msra.mxu3 %v2097_v28  ;;  %614 = vmatpush.bf16.msra.mxu0 %v2097_v28 }
  0x4f   : > { %703 = vmatpush.bf16.msra.mxu1 %v2101_v29  ;;  %1581 = vmatpush.bf16.msra.mxu2 %v2243_v61 }
  0x52   : > { %2425 = vmatpush.bf16.msra.mxu3 %v2089_v34  ;;  %615 = vmatpush.bf16.msra.mxu0 %v2089_v34 }
  0x53   : > { %704 = vmatpush.bf16.msra.mxu1 %v2093_v35  ;;  %1582 = vmatpush.bf16.msra.mxu2 %v2242_v62 }
  0x56   : > { %2426 = vmatpush.bf16.msra.mxu3 %v2081_v40  ;;  %616 = vmatpush.bf16.msra.mxu0 %v2081_v40 }
  0x57   : > { %705 = vmatpush.bf16.msra.mxu1 %v2085_v41  ;;  %1583 = vmatpush.bf16.msra.mxu2 %v2241_v63 }
  0x5a   : > { %2427 = vmatpush.bf16.msra.mxu3 %v2073_v46  ;;  %617 = vmatpush.bf16.msra.mxu0 %v2073_v46 }
  0x5b   : > { %706 = vmatpush.bf16.msra.mxu1 %v2077_v47  ;;  %1584 = vmatpush.bf16.msra.mxu2 %v2240_v0 }
  0x5d   : > { %678 = vmatmul.bf16.vlgmr.msra.gmra.mxu3 %v2217_v48  ;;  %618 = vmatmul.bf16.vlgmr.msra.gmra.mxu0 %v2205_v49 }
  0x5e   : > { %2428 = vmatpush.bf16.msrb.mxu3 %v3070_v7  ;;  %707 = vmatmul.bf16.vlgmr.msra.gmra.mxu1 %v2205_v49 }
  0x5f   : > { %1585 = vmatpush.bf16.msra.mxu2 %v2239_v5 }
  0x62   : > { %2429 = vmatpush.bf16.msrb.mxu3 %v3073_v11 }
  0x63   : > { %1586 = vmatpush.bf16.msra.mxu2 %v2238_v8 }
  0x66   : > { %2430 = vmatpush.bf16.msrb.mxu3 %v2117_v17 }
  0x67   : > { %1587 = vmatpush.bf16.msra.mxu2 %v2237_v13 }
  0x6a   : > { %2431 = vmatpush.bf16.msrb.mxu3 %v2109_v23 }
  0x6d   : > { %683 = vmatmul.bf16.gmra.mxu3 %v2218_v50  ;;  %623 = vmatmul.bf16.gmra.mxu0 %v2206_v51 }
  0x6e   : > { %2432 = vmatpush.bf16.msrb.mxu3 %v2101_v29  ;;  %712 = vmatmul.bf16.gmra.mxu1 %v2206_v51 }
  0x72   : > { %2433 = vmatpush.bf16.msrb.mxu3 %v2093_v35 }
  0x76   : > { %2434 = vmatpush.bf16.msrb.mxu3 %v2085_v41 }
  0x7a   : > { %2435 = vmatpush.bf16.msrb.mxu3 %v2077_v47 }
  0x7d   : > { %688 = vmatmul.bf16.gmra.mxu3 %v2219_v52  ;;  %628 = vmatmul.bf16.gmra.mxu0 %v2207_v53 }
  0x7e   : > { %717 = vmatmul.bf16.gmra.mxu1 %v2207_v53  ;;  %2436 = vmatpush.bf16.msra.mxu3 %v2244_v59 }
  0x82   : > { %2437 = vmatpush.bf16.msra.mxu3 %v2243_v61 }
  0x86   : > { %2438 = vmatpush.bf16.msra.mxu3 %v2242_v62 }
  0x8a   : > { %2439 = vmatpush.bf16.msra.mxu3 %v2241_v63 }
  0x8d   : > { %693 = vmatmul.bf16.gmra.mxu3 %v2220_v54  ;;  %633 = vmatmul.bf16.gmra.mxu0 %v2208_v55 }
  0x8e   : > { %722 = vmatmul.bf16.gmra.mxu1 %v2208_v55  ;;  %2440 = vmatpush.bf16.msra.mxu3 %v2240_v0 }
  0x92   : > { %2441 = vmatpush.bf16.msra.mxu3 %v2239_v5 }
  0x96   : > { %2442 = vmatpush.bf16.msra.mxu3 %v2238_v8 }
  0x9a   : > { %2443 = vmatpush.bf16.msra.mxu3 %v2237_v13 }
  0x9d   : > { %767 = vmatmul.bf16.vlgmr.msrb.gmra.mxu3 %v2217_v48  ;;  %638 = vmatmul.bf16.gmra.mxu0 %v2209_v56 }
  0x9e   : > { %727 = vmatmul.bf16.gmra.mxu1 %v2209_v56 }
  0xad   : > { %772 = vmatmul.bf16.gmra.mxu3 %v2218_v50  ;;  %643 = vmatmul.bf16.gmra.mxu0 %v2210_v57 }
  0xae   : > { %732 = vmatmul.bf16.gmra.mxu1 %v2210_v57 }
  0xbd   : > { %777 = vmatmul.bf16.gmra.mxu3 %v2219_v52  ;;  %648 = vmatmul.bf16.gmra.mxu0 %v2211_v58 }
  0xbe   : > { %737 = vmatmul.bf16.gmra.mxu1 %v2211_v58 }
  0xcd   : > { %782 = vmatmul.bf16.gmra.mxu3 %v2220_v54  ;;  %653 = vmatmul.bf16.gmra.mxu0 %v2212_v60 }
  0xce   : > { %742 = vmatmul.bf16.gmra.mxu1 %v2212_v60 }
  0xda   : > { %v3096_v3 = vpop.f32.mrf.mxu0 }
  0xdb   : > { %v708_v4 = vpop.f32.mrf.mxu1 }
  0xdc   : > { %v3099_v6 = vadd.f32 %v3093_v1, %v708_v4 }
  0xdd   : > { %658 = vmatmul.bf16.gmra.mxu0 %v2213_v2 }
  0xde   : > { %v2134_v7 = vmul.f32 -1.442695, %v3099_v6  ;;  %747 = vmatmul.bf16.gmra.mxu1 %v2213_v2 }
  0xe0   : > { %2540 = vpow2.f32 %v2134_v7  ;;  %v3102_v9 = vpop.f32.mrf.mxu3 }
  0xe2   : > { %v3104_v10 = vpop.f32.mrf.mxu0 }
  0xe3   : > { %v710_v11 = vpop.f32.mrf.mxu1 }
  0xe4   : > { %v3107_v12 = vadd.f32 %v3093_v1, %v710_v11 }
  0xe6   : > { %v2541_v14 = vpop.eup %2540  ;;  %v2135_v15 = vmul.f32 -1.442695, %v3107_v12 }
  0xe7   : > { %v920_v16 = vadd.f32 1.0, %v2541_v14 }
  0xe8   : > { %2542 = vpow2.f32 %v2135_v15  ;;  %v3110_v17 = vpop.f32.mrf.mxu3 }
  0xe9   : > { %2544 = vrcp.f32 %v920_v16  ;;  %v963_v38 = vand.u32 2147483648, %v920_v16  ;;  %vm957_vm1 = vweird.f32 %v920_v16  ;;  %v961_v39 = vand.u32 2147483647, %v920_v16 }
  0xea   : > { %v3113_v19 = vpop.f32.mrf.mxu0 }
  0xeb   : > { %v713_v20 = vpop.f32.mrf.mxu1  ;;  %v964_v45 = vor.u32 1.1754944e-38, %v963_v38  ;;  %vm962_vm3 = vcmp.eq.f32.partialorder %v961_v39, 8.507059e+37 }
  0xec   : > { %v3116_v21 = vadd.f32 %v3093_v1, %v713_v20 }
  0xed   : > { %663 = vmatmul.bf16.gmra.mxu0 %v2214_v18 }
  0xee   : > { %v2543_v22 = vpop.eup %2542  ;;  %v2136_v23 = vmul.f32 -1.442695, %v3116_v21  ;;  %752 = vmatmul.bf16.gmra.mxu1 %v2214_v18 }
  0xef   : > { %v2545_v24 = vpop.eup %2544  ;;  %v921_v25 = vadd.f32 1.0, %v2543_v22 }
  0xf0   : > { %2546 = vpow2.f32 %v2136_v23  ;;  %v3119_v26 = vpop.f32.mrf.mxu3  ;;  %v953_v27 = vmul.f32 %v2545_v24, %v920_v16  ;;  %vm958_vm0 = vweird.f32 %v2545_v24 }
  0xf1   : > { %2548 = vrcp.f32 %v921_v25  ;;  %vm959_vm2 = vmor %vm957_vm1, %vm958_vm0  ;;  %v976_v46 = vand.u32 2147483647, %v921_v25  ;;  %v978_v47 = vand.u32 2147483648, %v921_v25  ;;  %vm972_vm5 = vweird.f32 %v921_v25 }
  0xf2   : > { %v954_v28 = vsub.f32 1.0, %v953_v27  ;;  %v3121_v29 = vpop.f32.mrf.mxu0 }
  0xf3   : > { %v715_v30 = vpop.f32.mrf.mxu1  ;;  %vm977_vm7 = vcmp.eq.f32.partialorder %v976_v46, 8.507059e+37  ;;  %v979_v58 = vor.u32 1.1754944e-38, %v978_v47 }
  0xf4   : > { %v955_v31 = vmul.f32 %v2545_v24, %v954_v28  ;;  %v3124_v32 = vadd.f32 %v3093_v1, %v715_v30 }
  0xf6   : > { %v2547_v33 = vpop.eup %2546  ;;  %v956_v34 = vadd.f32 %v2545_v24, %v955_v31  ;;  %v2137_v35 = vmul.f32 -1.442695, %v3124_v32 }
  0xf7   : > { %v2549_v36 = vpop.eup %2548  ;;  %v3127_v37 = vadd.f32 1.0, %v2547_v33 }
  0xf8   : > { %2550 = vpow2.f32 %v2137_v35  ;;  %v3129_v40 = vpop.f32.mrf.mxu3  ;;  %v968_v41 = vmul.f32 %v2549_v36, %v921_v25  ;;  %v960_v42 = vsel %vm959_vm2, %v2545_v24, %v956_v34  ;;  %vm973_vm4 = vweird.f32 %v2549_v36  ;;  %v2216_v25 = vld [vmem:[%s3048_s23 + $0x58] sm:$0xff]  ;;  %s1846_s23 = sshll.u32 %s1843_s25, 4  ;;  %s1847_s23 = int_to_ptr.hbm [resolvable:$true] %s1846_s23 }
  0xf9   : > { %2552 = vrcp.f32 %v3127_v37  ;;  %v965_v52 = vsel %vm962_vm3, %v964_v45, %v960_v42  ;;  %vm974_vm6 = vmor %vm972_vm5, %vm973_vm4  ;;  %vm987_vm9 = vweird.f32 %v3127_v37  ;;  %s2803_s30 = sshra.s32 %s1847_s23, 4  ;;  %s2804_s30 = int_to_ptr.hbm [resolvable:$true] %s2803_s30 }
  0xfa   : > { %v969_v43 = vsub.f32 1.0, %v968_v41  ;;  %v3136_v51 = vpop.f32.mrf.mxu0  ;;  %v1432_v59 = vmul.f32 %v965_v52, %v3099_v6  ;;  %s2805_s10 = scalar_lea.hbm %s2804_s30, 128  ;;  %p2810_p12 = scmp.lt.s32.totalorder %s2804_s30, %s3999_s6 }
  0xfb   : > { %v718_v48 = vpop.f32.mrf.mxu1  ;;  %p2806_p4 = scmp.ne.s32.totalorder %s2804_s30, %s2805_s10  ;;  %p2811_p13 = scmp.lt.s32.totalorder %s2809_s29, %s2805_s10 }
  0xfc   : > { %v970_v49 = vmul.f32 %v2549_v36, %v969_v43  ;;  %v3134_v50 = vadd.f32 %v3093_v1, %v718_v48  ;;  %v1464_v5 = vadd.f32 %v1432_v59, %v3096_v3  ;;  %v993_v3 = vand.u32 2147483648, %v3127_v37 }
  0xfd   : > { %668 = vmatmul.bf16.gmra.mxu0 %v2215_v44  ;;  %p2807_p8 = pnand %p2806_p4, %p3010_p7  ;;  %p2812_p0 = por %p2811_p13, %p2810_p12 }
  0xfe   : > { %v2551_v53 = vpop.eup %2550  ;;  %v971_v54 = vadd.f32 %v2549_v36, %v970_v49  ;;  %v2138_v55 = vmul.f32 -1.442695, %v3134_v50  ;;  %757 = vmatmul.bf16.gmra.mxu1 %v2215_v44  ;;  %v994_v27 = vor.u32 1.1754944e-38, %v993_v3 }
  0xff   : > { %v2553_v56 = vpop.eup %2552  ;;  %v923_v57 = vadd.f32 1.0, %v2551_v53  ;;  %p2808_p10 = pneg %p2807_p8 }
 0x100   : > { %v975_v60 = vsel %vm974_vm6, %v2549_v36, %v971_v54  ;;  %2554 = vpow2.f32 %v2138_v55  ;;  %v3140_v61 = vpop.f32.mrf.mxu3  ;;  %v983_v62 = vmul.f32 %v2553_v56, %v3127_v37  ;;  %vm988_vm8 = vweird.f32 %v2553_v56 }
 0x101   : > { %2556 = vrcp.f32 %v923_v57  ;;  %v980_v63 = vsel %vm977_vm7, %v979_v58, %v975_v60  ;;  %vm989_vm10 = vmor %vm987_vm9, %vm988_vm8  ;;  %v1006_v28 = vand.u32 2147483647, %v923_v57  ;;  %v1008_v30 = vand.u32 2147483648, %v923_v57  ;;  %p2813_p3 = pnand %p2812_p0, %p2808_p10 }
 0x102   : > { %v1433_v0 = vmul.f32 %v980_v63, %v3107_v12  ;;  %v984_v2 = vsub.f32 1.0, %v983_v62  ;;  %v3150_v16 = vpop.f32.mrf.mxu0  ;;  %vm1002_vm13 = vweird.f32 %v923_v57 }
 0x103   : > { %v720_v4 = vpop.f32.mrf.mxu1  ;;  %vm1007_vm15 = vcmp.eq.f32.partialorder %v1006_v28, 8.507059e+37  ;;  %v1009_v42 = vor.u32 1.1754944e-38, %v1008_v30 }
 0x104   : > { %v1465_v7 = vadd.f32 %v1433_v0, %v3104_v10  ;;  %v985_v8 = vmul.f32 %v2553_v56, %v984_v2  ;;  %v3147_v11 = vadd.f32 %v3093_v1, %v720_v4  ;;  %v991_v10 = vand.u32 2147483647, %v3127_v37 }
 0x106   : > { %v2555_v6 = vpop.eup %2554  ;;  %v986_v13 = vadd.f32 %v2553_v56, %v985_v8  ;;  %v2139_v14 = vmul.f32 -1.442695, %v3147_v11  ;;  %v1496_v15 = vpack.c.bf16 %v1465_v7, %v1464_v5  ;;  %vm992_vm11 = vcmp.eq.f32.partialorder %v991_v10, 8.507059e+37 }
 0x107   : > { %v2557_v12 = vpop.eup %2556  ;;  %v3152_v18 = vadd.f32 1.0, %v2555_v6 }
 0x108   : > { %2558 = vpow2.f32 %v2139_v14  ;;  %1588 = vmatmul.bf16.vlgmr.msra.gmra.mxu2 %v1496_v15  ;;  %v3157_v20 = vpop.f32.mrf.mxu3  ;;  %v998_v22 = vmul.f32 %v2557_v12, %v923_v57  ;;  %v990_v23 = vsel %vm989_vm10, %v2553_v56, %v986_v13  ;;  %vm1003_vm12 = vweird.f32 %v2557_v12 }
 0x109   : > { %2560 = vrcp.f32 %v3152_v18  ;;  %v995_v35 = vsel %vm992_vm11, %v994_v27, %v990_v23  ;;  %vm1004_vm14 = vmor %vm1002_vm13, %vm1003_vm12  ;;  %v1023_v59 = vand.u32 2147483648, %v3152_v18  ;;  %vm1017_vm1 = vweird.f32 %v3152_v18 }
 0x10a   : > { %v999_v24 = vsub.f32 1.0, %v998_v22  ;;  %v1434_v43 = vmul.f32 %v995_v35, %v3116_v21  ;;  %v3169_v47 = vpop.f32.mrf.mxu0 }
 0x10b   : > { %v723_v31 = vpop.f32.mrf.mxu1  ;;  %v1024_v5 = vor.u32 1.1754944e-38, %v1023_v59 }
 0x10c   : > { %v1000_v33 = vmul.f32 %v2557_v12, %v999_v24  ;;  %v3162_v34 = vadd.f32 %v3093_v1, %v723_v31  ;;  %v1466_v54 = vadd.f32 %v1434_v43, %v3113_v19  ;;  %v1021_v19 = vand.u32 2147483647, %v3152_v18 }
 0x10d   : > { %673 = vmatmul.bf16.gmra.mxu0 %v2216_v25 }
 0x10e   : > { %v2559_v36 = vpop.eup %2558  ;;  %v1001_v37 = vadd.f32 %v2557_v12, %v1000_v33  ;;  %v2140_v38 = vmul.f32 -1.442695, %v3162_v34  ;;  %762 = vmatmul.bf16.gmra.mxu1 %v2216_v25  ;;  %vm1022_vm3 = vcmp.eq.f32.partialorder %v1021_v19, 8.507059e+37 }
 0x10f   : > { %v2561_v39 = vpop.eup %2560  ;;  %v925_v41 = vadd.f32 1.0, %v2559_v36 }
 0x110   : > { %v1005_v44 = vsel %vm1004_vm14, %v2557_v12, %v1001_v37  ;;  %2562 = vpow2.f32 %v2140_v38  ;;  %v3166_v45 = vpop.f32.mrf.mxu3  ;;  %v1013_v46 = vmul.f32 %v2561_v39, %v3152_v18  ;;  %vm1018_vm0 = vweird.f32 %v2561_v39 }
 0x111   : > { %2564 = vrcp.f32 %v925_v41  ;;  %v1010_v48 = vsel %vm1007_vm15, %v1009_v42, %v1005_v44  ;;  %vm3183_vm2 = vmor %vm1017_vm1, %vm1018_vm0  ;;  %v1036_v6 = vand.u32 2147483647, %v925_v41  ;;  %v1038_v13 = vand.u32 2147483648, %v925_v41 }
 0x112   : > { %v1435_v49 = vmul.f32 %v1010_v48, %v3124_v32  ;;  %v1014_v52 = vsub.f32 1.0, %v1013_v46  ;;  %v3193_v8 = vpop.f32.mrf.mxu0  ;;  %vm1032_vm5 = vweird.f32 %v925_v41 }
 0x113   : > { %v725_v53 = vpop.f32.mrf.mxu1  ;;  %v1039_v27 = vor.u32 1.1754944e-38, %v1038_v13  ;;  %vm1037_vm7 = vcmp.eq.f32.partialorder %v1036_v6, 8.507059e+37 }
 0x114   : > { %v1467_v55 = vadd.f32 %v1435_v49, %v3121_v29  ;;  %v1015_v56 = vmul.f32 %v2561_v39, %v1014_v52  ;;  %v3175_v21 = vadd.f32 %v3093_v1, %v725_v53 }
 0x116   : > { %v2563_v57 = vpop.eup %2562  ;;  %v1016_v58 = vadd.f32 %v2561_v39, %v1015_v56  ;;  %v2141_v60 = vmul.f32 -1.442695, %v3175_v21  ;;  %v1497_v62 = vpack.c.bf16 %v1467_v55, %v1466_v54 }
 0x117   : > { %v2565_v32 = vpop.eup %2564  ;;  %v3179_v63 = vadd.f32 1.0, %v2563_v57 }
 0x118   : > { %2566 = vpow2.f32 %v2141_v60  ;;  %1593 = vmatmul.bf16.gmra.mxu2 %v1497_v62  ;;  %v3187_v0 = vpop.f32.mrf.mxu3  ;;  %v1028_v2 = vmul.f32 %v2565_v32, %v925_v41  ;;  %v1020_v4 = vsel %vm3183_vm2, %v2561_v39, %v1016_v58  ;;  %vm1033_vm4 = vweird.f32 %v2565_v32 }
 0x119   : > { %2568 = vrcp.f32 %v3179_v63  ;;  %v1025_v15 = vsel %vm1022_vm3, %v1024_v5, %v1020_v4  ;;  %vm1034_vm6 = vmor %vm1032_vm5, %vm1033_vm4  ;;  %v1053_v39 = vand.u32 2147483648, %v3179_v63  ;;  %vm1047_vm9 = vweird.f32 %v3179_v63 }
 0x11a   : > { %v1029_v7 = vsub.f32 1.0, %v1028_v2  ;;  %v1436_v24 = vmul.f32 %v1025_v15, %v3134_v50  ;;  %v3222_v46 = vpop.f32.mrf.mxu0 }
 0x11b   : > { %v728_v14 = vpop.f32.mrf.mxu1  ;;  %v1054_v55 = vor.u32 1.1754944e-38, %v1053_v39 }
 0x11c   : > { %v1030_v12 = vmul.f32 %v2565_v32, %v1029_v7  ;;  %v3199_v18 = vadd.f32 %v3093_v1, %v728_v14  ;;  %v1468_v50 = vadd.f32 %v1436_v24, %v3136_v51 }
 0x11e   : > { %v2567_v3 = vpop.eup %2566  ;;  %v1031_v10 = vadd.f32 %v2565_v32, %v1030_v12  ;;  %v2142_v22 = vmul.f32 -1.442695, %v3199_v18 }
 0x11f   : > { %v2569_v23 = vpop.eup %2568  ;;  %v3207_v25 = vadd.f32 1.0, %v2567_v3 }
 0x120   : > { %v1035_v28 = vsel %vm1034_vm6, %v2565_v32, %v1031_v10  ;;  %2570 = vpow2.f32 %v2142_v22  ;;  %v768_v30 = vpop.f32.mrf.mxu3  ;;  %v1043_v31 = vmul.f32 %v2569_v23, %v3179_v63  ;;  %vm1048_vm8 = vweird.f32 %v2569_v23 }
 0x121   : > { %2572 = vrcp.f32 %v3207_v25  ;;  %v1040_v33 = vsel %vm1037_vm7, %v1039_v27, %v1035_v28  ;;  %v3212_v35 = vadd.f32 %v3093_v1, %v768_v30  ;;  %vm1049_vm10 = vmor %vm1047_vm9, %vm1048_vm8  ;;  %v1068_v4 = vand.u32 2147483648, %v3207_v25 }
 0x122   : > { %v1437_v36 = vmul.f32 %v1040_v33, %v3147_v11  ;;  %v1044_v37 = vsub.f32 1.0, %v1043_v31  ;;  %v1051_v11 = vand.u32 2147483647, %v3179_v63  ;;  %v1066_v63 = vand.u32 2147483647, %v3207_v25  ;;  %v3246_v14 = vpop.f32.mrf.mxu0 }
 0x123   : > { %v2158_v38 = vmul.f32 -1.442695, %v3212_v35  ;;  %v730_v41 = vpop.f32.mrf.mxu1  ;;  %vm1062_vm13 = vweird.f32 %v3207_v25  ;;  %v1069_v22 = vor.u32 1.1754944e-38, %v1068_v4 }
 0x124   : > { %v1469_v42 = vadd.f32 %v1437_v36, %v3150_v16  ;;  %v1045_v43 = vmul.f32 %v2569_v23, %v1044_v37  ;;  %v3220_v44 = vadd.f32 %v3093_v1, %v730_v41  ;;  %vm1052_vm11 = vcmp.eq.f32.partialorder %v1051_v11, 8.507059e+37 }
 0x125   : > { %2574 = vpow2.f32 %v2158_v38  ;;  %vm1067_vm15 = vcmp.eq.f32.partialorder %v1066_v63, 8.507059e+37 }
 0x126   : > { %v2571_v48 = vpop.eup %2570  ;;  %v1046_v49 = vadd.f32 %v2569_v23, %v1045_v43  ;;  %v2143_v51 = vmul.f32 -1.442695, %v3220_v44  ;;  %v1498_v52 = vpack.c.bf16 %v1469_v42, %v1468_v50 }
 0x127   : > { %v2573_v53 = vpop.eup %2572  ;;  %v3227_v54 = vadd.f32 1.0, %v2571_v48 }
 0x128   : > { %v1050_v16 = vsel %vm1049_vm10, %v2569_v23, %v1046_v49  ;;  %2576 = vpow2.f32 %v2143_v51  ;;  %1598 = vmatmul.bf16.gmra.mxu2 %v1498_v52  ;;  %v770_v56 = vpop.f32.mrf.mxu3  ;;  %v1058_v57 = vmul.f32 %v2573_v53, %v3207_v25  ;;  %vm1063_vm12 = vweird.f32 %v2573_v53 }
 0x129   : > { %2578 = vrcp.f32 %v3227_v54  ;;  %v3232_v58 = vadd.f32 %v3093_v1, %v770_v56  ;;  %v1055_v59 = vsel %vm1052_vm11, %v1054_v55, %v1050_v16  ;;  %v1081_v13 = vand.u32 2147483647, %v3227_v54  ;;  %vm1064_vm14 = vmor %vm1062_vm13, %vm1063_vm12 }
 0x12a   : > { %v1059_v60 = vsub.f32 1.0, %v1058_v57  ;;  %v1438_v7 = vmul.f32 %v1055_v59, %v3162_v34  ;;  %v1083_v34 = vand.u32 2147483648, %v3227_v54  ;;  %vm1077_vm0 = vweird.f32 %v3227_v54  ;;  %v3299_v63 = vpop.f32.mrf.mxu0 }
 0x12b   : > { %v2575_v62 = vpop.eup %2574  ;;  %v2159_v32 = vmul.f32 -1.442695, %v3232_v58  ;;  %v733_v19 = vpop.f32.mrf.mxu1  ;;  %vm3265_vm1 = vcmp.eq.f32.partialorder %v1081_v13, 8.507059e+37 }
 0x12c   : > { %v3236_v29 = vadd.f32 1.0, %v2575_v62  ;;  %v1060_v2 = vmul.f32 %v2573_v53, %v1059_v60  ;;  %v3240_v5 = vadd.f32 %v3093_v1, %v733_v19  ;;  %v1470_v25 = vadd.f32 %v1438_v7, %v3169_v47 }
 0x12d   : > { %2580 = vpow2.f32 %v2159_v32  ;;  %v1084_v47 = vor.u32 1.1754944e-38, %v1083_v34 }
 0x12e   : > { %v2577_v6 = vpop.eup %2576  ;;  %2582 = vrcp.f32 %v3236_v29  ;;  %v1061_v3 = vadd.f32 %v2573_v53, %v1060_v2  ;;  %v2144_v10 = vmul.f32 -1.442695, %v3240_v5  ;;  %v1321_v30 = vand.u32 2147483647, %v3236_v29 }
 0x12f   : > { %v3248_v15 = vpop.eup %2578  ;;  %v3250_v12 = vadd.f32 1.0, %v2577_v6  ;;  %v1323_v42 = vand.u32 2147483648, %v3236_v29  ;;  %vm1317_vm3 = vweird.f32 %v3236_v29 }
 0x130   : > { %v773_v23 = vpop.f32.mrf.mxu3  ;;  %v1073_v24 = vmul.f32 %v3248_v15, %v3227_v54  ;;  %v1065_v27 = vsel %vm1064_vm14, %v2573_v53, %v1061_v3  ;;  %vm1078_vm2 = vweird.f32 %v3248_v15  ;;  %vm3280_vm5 = vcmp.eq.f32.partialorder %v1321_v30, 8.507059e+37 }
 0x131   : > { %2584 = vrcp.f32 %v3250_v12  ;;  %v3260_v28 = vadd.f32 %v3093_v1, %v773_v23  ;;  %v1070_v31 = vsel %vm1067_vm15, %v1069_v22, %v1065_v27  ;;  %v1324_v57 = vor.u32 1.1754944e-38, %v1323_v42  ;;  %vm3291_vm6 = vmor %vm1077_vm0, %vm1078_vm2 }
 0x132   : > { %2586 = vpow2.f32 %v2144_v10  ;;  %v1074_v33 = vsub.f32 1.0, %v1073_v24  ;;  %v1439_v37 = vmul.f32 %v1070_v31, %v3175_v21  ;;  %vm1092_vm7 = vweird.f32 %v3250_v12  ;;  %v3369_v59 = vpop.f32.mrf.mxu0 }
 0x133   : > { %v2581_v36 = vpop.eup %2580  ;;  %v2160_v50 = vmul.f32 -1.442695, %v3260_v28  ;;  %v735_v39 = vpop.f32.mrf.mxu1  ;;  %v1096_v32 = vand.u32 2147483647, %v3250_v12  ;;  %v1098_v3 = vand.u32 2147483648, %v3250_v12 }
 0x134   : > { %v2583_v41 = vpop.eup %2582  ;;  %v3270_v43 = vadd.f32 1.0, %v2581_v36  ;;  %v1075_v11 = vmul.f32 %v3248_v15, %v1074_v33  ;;  %v3274_v48 = vadd.f32 %v3093_v1, %v735_v39  ;;  %v1471_v49 = vadd.f32 %v1439_v37, %v3193_v8 }
 0x135   : > { %v1313_v21 = vmul.f32 %v2583_v41, %v3236_v29  ;;  %2588 = vpow2.f32 %v2160_v50  ;;  %vm1318_vm4 = vweird.f32 %v2583_v41  ;;  %vm3333_vm10 = vcmp.eq.f32.partialorder %v1096_v32, 8.507059e+37 }
 0x136   : > { %2590 = vrcp.f32 %v3270_v43  ;;  %v1076_v16 = vadd.f32 %v3248_v15, %v1075_v11  ;;  %v2145_v55 = vmul.f32 -1.442695, %v3274_v48  ;;  %v1499_v8 = vpack.c.bf16 %v1471_v49, %v1470_v25  ;;  %vm3309_vm8 = vmor %vm1317_vm3, %vm1318_vm4 }
 0x137   : > { %v3285_v52 = vpop.eup %2584  ;;  %v1314_v53 = vsub.f32 1.0, %v1313_v21  ;;  %v1336_v7 = vand.u32 2147483647, %v3270_v43  ;;  %vm1332_vm9 = vweird.f32 %v3270_v43 }
 0x138   : > { %v2587_v56 = vpop.eup %2586  ;;  %v775_v60 = vpop.f32.mrf.mxu3  ;;  %v1088_v62 = vmul.f32 %v3285_v52, %v3250_v12  ;;  %v1080_v54 = vsel %vm3291_vm6, %v3248_v15, %v1076_v16  ;;  %2592 = vpow2.f32 %v2145_v55  ;;  %1603 = vmatmul.bf16.gmra.mxu2 %v1499_v8  ;;  %v1338_v15 = vand.u32 2147483648, %v3270_v43 }
 0x139   : > { %v1315_v19 = vmul.f32 %v2583_v41, %v1314_v53  ;;  %v3301_v2 = vadd.f32 1.0, %v2587_v56  ;;  %v3315_v6 = vadd.f32 %v3093_v1, %v775_v60  ;;  %v1085_v29 = vsel %vm3265_vm1, %v1084_v47, %v1080_v54 }
 0x13a   : > { %v1089_v13 = vsub.f32 1.0, %v1088_v62  ;;  %vm3337_vm11 = vcmp.eq.f32.partialorder %v1336_v7, 8.507059e+37  ;;  %v1440_v50 = vmul.f32 %v1085_v29, %v3199_v18  ;;  %vm1093_vm12 = vweird.f32 %v3285_v52 }
 0x13b   : > { %v2589_v10 = vpop.eup %2588  ;;  %v1316_v34 = vadd.f32 %v2583_v41, %v1315_v19  ;;  %2594 = vrcp.f32 %v3301_v2  ;;  %v738_v22 = vpop.f32.mrf.mxu1  ;;  %v2161_v25 = vmul.f32 -1.442695, %v3315_v6  ;;  %vm1094_vm14 = vmor %vm1092_vm7, %vm1093_vm12  ;;  %v1099_v16 = vor.u32 1.1754944e-38, %v1098_v3 }
 0x13c   : > { %v2591_v23 = vpop.eup %2590  ;;  %v3322_v24 = vadd.f32 1.0, %v2589_v10  ;;  %v1090_v27 = vmul.f32 %v3285_v52, %v1089_v13  ;;  %v3327_v30 = vadd.f32 %v3093_v1, %v738_v22  ;;  %vm1107_vm15 = vweird.f32 %v3301_v2 }
 0x13d   : > { %v1320_v31 = vsel %vm3309_vm8, %v2583_v41, %v1316_v34  ;;  %v1328_v33 = vmul.f32 %v2591_v23, %v3270_v43  ;;  %vm1333_vm13 = vweird.f32 %v2591_v23  ;;  %v1339_v41 = vor.u32 1.1754944e-38, %v1338_v15 }
 0x13e   : > { %2596 = vrcp.f32 %v3322_v24  ;;  %v2593_v38 = vpop.eup %2592  ;;  %v1325_v47 = vsel %vm3280_vm5, %v1324_v57, %v1320_v31  ;;  %v1091_v11 = vadd.f32 %v3285_v52, %v1090_v27  ;;  %v2146_v21 = vmul.f32 -1.442695, %v3327_v30  ;;  %vm3361_vm0 = vmor %vm1332_vm9, %vm1333_vm13 }
 0x13f   : > { %v1329_v39 = vsub.f32 1.0, %v1328_v33  ;;  %2598 = vpow2.f32 %v2161_v25  ;;  %v3346_v42 = vadd.f32 1.0, %v2593_v38  ;;  %v1456_v55 = vmul.f32 %v1325_v47, %v3212_v35 }
 0x140   : > { %v778_v49 = vpop.f32.mrf.mxu3  ;;  %v1472_v56 = vadd.f32 %v1440_v50, %v3222_v46  ;;  %v1095_v57 = vsel %vm1094_vm14, %v3285_v52, %v1091_v11  ;;  %2600 = vpow2.f32 %v2146_v21  ;;  %vm1347_vm1 = vweird.f32 %v3322_v24 }
 0x141   : > { %v3350_v53 = vpop.eup %2594  ;;  %v1330_v18 = vmul.f32 %v2591_v23, %v1329_v39  ;;  %v3355_v51 = vadd.f32 %v3093_v1, %v778_v49  ;;  %v1100_v62 = vsel %vm3333_vm10, %v1099_v16, %v1095_v57  ;;  %2602 = vrcp.f32 %v3346_v42 }
 0x142   : > { %v1103_v12 = vmul.f32 %v3350_v53, %v3301_v2  ;;  %v1441_v46 = vmul.f32 %v1100_v62, %v3220_v44  ;;  %v1353_v7 = vand.u32 2147483648, %v3322_v24  ;;  %v1488_v34 = vadd.f32 %v1456_v55, %v3102_v9 }
 0x143   : > { %v1331_v60 = vadd.f32 %v2591_v23, %v1330_v18  ;;  %v2162_v35 = vmul.f32 -1.442695, %v3355_v51  ;;  %v740_v43 = vpop.f32.mrf.mxu1  ;;  %vm1108_vm2 = vweird.f32 %v3350_v53  ;;  %v1111_v22 = vand.u32 2147483647, %v3301_v2 }
 0x144   : > { %v3374_v32 = vpop.eup %2596  ;;  %v1104_v52 = vsub.f32 1.0, %v1103_v12  ;;  %v1473_v10 = vadd.f32 %v1441_v46, %v3246_v14  ;;  %v1351_v36 = vand.u32 2147483647, %v3322_v24  ;;  %vm3410_vm4 = vmor %vm1107_vm15, %vm1108_vm2  ;;  %v1354_v55 = vor.u32 1.1754944e-38, %v1353_v7 }
 0x145   : > { %v2599_v19 = vpop.eup %2598  ;;  %v1335_v54 = vsel %vm3361_vm0, %v2591_v23, %v1331_v60  ;;  %v1343_v4 = vmul.f32 %v3374_v32, %v3322_v24  ;;  %2604 = vpow2.f32 %v2162_v35  ;;  %vm1348_vm3 = vweird.f32 %v3374_v32  ;;  %v3433_v24 = vpop.f32.mrf.mxu0 }
 0x146   : > { %v1340_v13 = vsel %vm3337_vm11, %v1339_v41, %v1335_v54  ;;  %v3386_v3 = vadd.f32 1.0, %v2599_v19  ;;  %v1105_v44 = vmul.f32 %v3350_v53, %v1104_v52  ;;  %v1113_v23 = vand.u32 2147483648, %v3301_v2  ;;  %v2601_v27 = vpop.eup %2600  ;;  %vm3419_vm5 = vmor %vm1347_vm1, %vm1348_vm3 }
 0x147   : > { %v1457_v15 = vmul.f32 %v1340_v13, %v3232_v58  ;;  %v1344_v29 = vsub.f32 1.0, %v1343_v4  ;;  %v3401_v58 = vadd.f32 %v3093_v1, %v740_v43  ;;  %v3403_v33 = vpop.eup %2602  ;;  %v3406_v37 = vadd.f32 1.0, %v2601_v27 }
 0x148   : > { %2606 = vrcp.f32 %v3386_v3  ;;  %v780_v25 = vpop.f32.mrf.mxu3  ;;  %v1106_v9 = vadd.f32 %v3350_v53, %v1105_v44  ;;  %v1114_v18 = vor.u32 1.1754944e-38, %v1113_v23  ;;  %vm1112_vm6 = vcmp.eq.f32.partialorder %v1111_v22, 8.507059e+37 }
 0x149   : > { %v1489_v14 = vadd.f32 %v1457_v15, %v3110_v17  ;;  %v1345_v31 = vmul.f32 %v3374_v32, %v1344_v29  ;;  %v1500_v17 = vpack.c.bf16 %v1473_v10, %v1472_v56  ;;  %v2147_v11 = vmul.f32 -1.442695, %v3401_v58 }
 0x14a   : > { %v1110_v2 = vsel %vm3410_vm4, %v3350_v53, %v1106_v9  ;;  %2608 = vrcp.f32 %v3406_v37  ;;  %v3431_v16 = vadd.f32 %v3093_v1, %v780_v25  ;;  %v1118_v53 = vmul.f32 %v3403_v33, %v3346_v42 }
 0x14b   : > { %v2605_v38 = vpop.eup %2604  ;;  %v1508_v47 = vpack.c.bf16 %v1489_v14, %v1488_v34  ;;  %v1346_v39 = vadd.f32 %v3374_v32, %v1345_v31  ;;  %v743_v21 = vpop.f32.mrf.mxu1  ;;  %1608 = vmatmul.bf16.gmra.mxu2 %v1500_v17  ;;  %2610 = vpow2.f32 %v2147_v11  ;;  %vm1352_vm7 = vcmp.eq.f32.partialorder %v1351_v36, 8.507059e+37 }
 0x14c   : > { %v3428_v49 = vadd.f32 1.0, %v2605_v38  ;;  %v1115_v57 = vsel %vm1112_vm6, %v1114_v18, %v1110_v2  ;;  %vm1362_vm8 = vweird.f32 %v3386_v3  ;;  %v1366_v60 = vand.u32 2147483647, %v3386_v3 }
 0x14d   : > { %1648 = vmatmul.bf16.vlgmr.msra.gmra.mxu3 %v1508_v47  ;;  %v1350_v56 = vsel %vm3419_vm5, %v3374_v32, %v1346_v39  ;;  %v1368_v62 = vand.u32 2147483648, %v3386_v3  ;;  %v2163_v35 = vmul.f32 -1.442695, %v3431_v16  ;;  %v1119_v43 = vsub.f32 1.0, %v1118_v53  ;;  %v3480_v17 = vpop.f32.mrf.mxu0 }
 0x14e   : > { %v3437_v8 = vpop.eup %2606  ;;  %2612 = vrcp.f32 %v3428_v49  ;;  %v1355_v52 = vsel %vm1352_vm7, %v1354_v55, %v1350_v56  ;;  %v1442_v32 = vmul.f32 %v1115_v57, %v3240_v5  ;;  %vm1123_vm9 = vweird.f32 %v3403_v33 }
 0x14f   : > { %v1358_v12 = vmul.f32 %v3437_v8, %v3386_v3  ;;  %2614 = vpow2.f32 %v2163_v35  ;;  %v1120_v4 = vmul.f32 %v3403_v33, %v1119_v43  ;;  %v1126_v7 = vand.u32 2147483647, %v3346_v42 }
 0x150   : > { %v783_v46 = vpop.f32.mrf.mxu3  ;;  %v3451_v54 = vpop.eup %2608  ;;  %v1128_v13 = vand.u32 2147483648, %v3346_v42  ;;  %v3458_v34 = vadd.f32 %v3093_v1, %v743_v21  ;;  %vm1363_vm10 = vweird.f32 %v3437_v8  ;;  %vm1122_vm11 = vweird.f32 %v3346_v42  ;;  %v3583_v21 = vld [vmem:[%s3996_s3] ss:$0 sm:$0xff] }
 0x151   : > { %v1359_v19 = vsub.f32 1.0, %v1358_v12  ;;  %v2611_v10 = vpop.eup %2610  ;;  %v3461_v15 = vadd.f32 %v3093_v1, %v783_v46  ;;  %v1133_v5 = vmul.f32 %v3451_v54, %v3406_v37  ;;  %v1121_v25 = vadd.f32 %v3403_v33, %v1120_v4  ;;  %vm1124_vm12 = vmor %vm1122_vm11, %vm1123_vm9 }
 0x152   : > { %v3468_v23 = vadd.f32 1.0, %v2611_v10  ;;  %vm1127_vm13 = vcmp.eq.f32.partialorder %v1126_v7, 8.507059e+37  ;;  %v1129_v14 = vor.u32 1.1754944e-38, %v1128_v13  ;;  %v2148_v31 = vmul.f32 -1.442695, %v3458_v34  ;;  %vm3487_vm14 = vmor %vm1362_vm8, %vm1363_vm10 }
 0x153   : > { %v1360_v44 = vmul.f32 %v3437_v8, %v1359_v19  ;;  %v745_v29 = vpop.f32.mrf.mxu1  ;;  %v1125_v9 = vsel %vm1124_vm12, %v3403_v33, %v1121_v25  ;;  %v2164_v36 = vmul.f32 -1.442695, %v3461_v15  ;;  %v1134_v50 = vsub.f32 1.0, %v1133_v5 }
 0x154   : > { %v3465_v22 = vpop.eup %2612  ;;  %2616 = vrcp.f32 %v3468_v23  ;;  %v1130_v47 = vsel %vm1127_vm13, %v1129_v14, %v1125_v9  ;;  %v1381_v33 = vand.u32 2147483647, %v3428_v49  ;;  %vm3494_vm15 = vcmp.eq.f32.partialorder %v1366_v60, 8.507059e+37 }
 0x155   : > { %v1373_v27 = vmul.f32 %v3465_v22, %v3428_v49  ;;  %v1361_v42 = vadd.f32 %v3437_v8, %v1360_v44  ;;  %2618 = vpow2.f32 %v2148_v31  ;;  %v2615_v39 = vpop.eup %2614  ;;  %v1443_v2 = vmul.f32 %v1130_v47, %v3274_v48  ;;  %v3558_v31 = vpop.f32.mrf.mxu0 }
 0x156   : > { %2620 = vpow2.f32 %v2164_v36  ;;  %v1135_v11 = vmul.f32 %v3451_v54, %v1134_v50  ;;  %v1383_v55 = vand.u32 2147483648, %v3428_v49  ;;  %v3500_v3 = vadd.f32 1.0, %v2615_v39 }
 0x157   : > { %v1374_v38 = vsub.f32 1.0, %v1373_v27  ;;  %v1369_v53 = vor.u32 1.1754944e-38, %v1368_v62  ;;  %vm1377_vm0 = vweird.f32 %v3428_v49  ;;  %vm1378_vm1 = vweird.f32 %v3465_v22 }
 0x158   : > { %v1475_v48 = vadd.f32 %v1443_v2, %v3369_v59  ;;  %v1458_v56 = vmul.f32 %v1355_v52, %v3260_v28  ;;  %v1365_v57 = vsel %vm3487_vm14, %v3437_v8, %v1361_v42  ;;  %v1474_v12 = vadd.f32 %v1442_v32, %v3299_v63  ;;  %v785_v28 = vpop.f32.mrf.mxu3  ;;  %vm3522_vm4 = vmor %vm1377_vm0, %vm1378_vm1 }
 0x159   : > { %v1375_v18 = vmul.f32 %v3465_v22, %v1374_v38  ;;  %2622 = vrcp.f32 %v3500_v3  ;;  %vm3514_vm2 = vcmp.eq.f32.partialorder %v1381_v33, 8.507059e+37  ;;  %v1136_v59 = vadd.f32 %v3451_v54, %v1135_v11 }
 0x15a   : > { %v3511_v35 = vpop.eup %2616  ;;  %vm1138_vm3 = vweird.f32 %v3451_v54  ;;  %v1384_v8 = vor.u32 1.1754944e-38, %v1383_v55  ;;  %v1143_v52 = vand.u32 2147483648, %v3406_v37  ;;  %v3528_v19 = vadd.f32 %v3093_v1, %v745_v29 }
 0x15b   : > { %v748_v60 = vpop.f32.mrf.mxu1  ;;  %v1376_v62 = vadd.f32 %v3465_v22, %v1375_v18  ;;  %v2619_v46 = vpop.eup %2618  ;;  %v1501_v32 = vpack.c.bf16 %v1475_v48, %v1474_v12  ;;  %v1370_v7 = vsel %vm3494_vm15, %v1369_v53, %v1365_v57  ;;  %vm1137_vm5 = vweird.f32 %v3406_v37 }
 0x15c   : > { %v2621_v4 = vpop.eup %2620  ;;  %v3532_v13 = vadd.f32 1.0, %v2619_v46  ;;  %v1141_v49 = vand.u32 2147483647, %v3406_v37  ;;  %v1396_v10 = vand.u32 2147483647, %v3500_v3  ;;  %vm3541_vm6 = vmor %vm1137_vm5, %vm1138_vm3  ;;  %v3547_v25 = vadd.f32 %v3093_v1, %v785_v28 }
 0x15d   : > { %v3537_v44 = vadd.f32 1.0, %v2621_v4  ;;  %v2149_v29 = vmul.f32 -1.442695, %v3528_v19  ;;  %1613 = vmatmul.bf16.gmra.mxu2 %v1501_v32  ;;  %v1380_v37 = vsel %vm3522_vm4, %v3465_v22, %v1376_v62  ;;  %v1140_v27 = vsel %vm3541_vm6, %v3451_v54, %v1136_v59 }
 0x15e   : > { %2624 = vrcp.f32 %v3532_v13  ;;  %v1148_v14 = vmul.f32 %v3511_v35, %v3468_v23  ;;  %v1459_v1 = vmul.f32 %v1370_v7, %v3315_v6  ;;  %vm1392_vm7 = vweird.f32 %v3500_v3 }
 0x15f   : > { %v3560_v9 = vpop.eup %2622  ;;  %2626 = vrcp.f32 %v3537_v44  ;;  %v1144_v22 = vor.u32 1.1754944e-38, %v1143_v52  ;;  %v1398_v50 = vand.u32 2147483648, %v3500_v3  ;;  %vm1142_vm8 = vcmp.eq.f32.partialorder %v1141_v49, 8.507059e+37  ;;  %v3621_v49 = vpop.f32.mrf.mxu0 }
 0x160   : > { %v1388_v36 = vmul.f32 %v3560_v9, %v3500_v3  ;;  %2628 = vpow2.f32 %v2149_v29  ;;  %v1385_v54 = vsel %vm3514_vm2, %v1384_v8, %v1380_v37  ;;  %vm3570_vm9 = vcmp.eq.f32.partialorder %v1396_v10, 8.507059e+37 }
 0x161   : > { %v1145_v6 = vsel %vm1142_vm8, %v1144_v22, %v1140_v27  ;;  %v2165_v38 = vmul.f32 -1.442695, %v3547_v25  ;;  %v1149_v47 = vsub.f32 1.0, %v1148_v14  ;;  %vm1393_vm10 = vweird.f32 %v3560_v9 }
 0x162   : > { %v1389_v41 = vsub.f32 1.0, %v1388_v36  ;;  %vm1153_vm11 = vweird.f32 %v3511_v35  ;;  %v1156_v33 = vand.u32 2147483647, %v3468_v23  ;;  %v1158_v11 = vand.u32 2147483648, %v3468_v23  ;;  %vm3598_vm13 = vmor %vm1392_vm7, %vm1393_vm10 }
 0x163   : > { %v750_v39 = vpop.f32.mrf.mxu1  ;;  %2630 = vpow2.f32 %v2165_v38  ;;  %v1150_v2 = vmul.f32 %v3511_v35, %v1149_v47  ;;  %v3586_v18 = vadd.f32 %v3583_v21, %v748_v60  ;;  %vm1152_vm12 = vweird.f32 %v3468_v23 }
 0x164   : > { %v3588_v55 = vpop.eup %2624  ;;  %v1390_v53 = vmul.f32 %v3560_v9, %v1389_v41  ;;  %v1490_v48 = vadd.f32 %v1458_v56, %v3119_v26  ;;  %v1491_v57 = vadd.f32 %v1459_v1, %v3129_v40  ;;  %vm3603_vm14 = vcmp.eq.f32.partialorder %v1156_v33, 8.507059e+37  ;;  %vm1154_vm15 = vmor %vm1152_vm12, %vm1153_vm11 }
 0x165   : > { %v3594_v12 = vpop.eup %2626  ;;  %v1151_v60 = vadd.f32 %v3511_v35, %v1150_v2  ;;  %v2150_v23 = vmul.f32 -1.442695, %v3586_v18  ;;  %v1163_v26 = vmul.f32 %v3588_v55, %v3532_v13  ;;  %v1159_v59 = vor.u32 1.1754944e-38, %v1158_v11 }
 0x166   : > { %v2629_v40 = vpop.eup %2628  ;;  %v1391_v56 = vadd.f32 %v3560_v9, %v1390_v53  ;;  %v1403_v3 = vmul.f32 %v3594_v12, %v3537_v44  ;;  %v1509_v28 = vpack.c.bf16 %v1491_v57, %v1490_v48  ;;  %v1399_v52 = vor.u32 1.1754944e-38, %v1398_v50 }
 0x167   : > { %v3615_v46 = vadd.f32 1.0, %v2629_v40  ;;  %v1155_v63 = vsel %vm1154_vm15, %v3511_v35, %v1151_v60  ;;  %2632 = vpow2.f32 %v2150_v23  ;;  %v1164_v8 = vsub.f32 1.0, %v1163_v26  ;;  %v3696_v40 = vpop.f32.mrf.mxu0 }
 0x168   : > { %v1404_v32 = vsub.f32 1.0, %v1403_v3  ;;  %v1444_v4 = vmul.f32 %v1145_v6, %v3327_v30  ;;  %v1160_v7 = vsel %vm3603_vm14, %v1159_v59, %v1155_v63  ;;  %1653 = vmatmul.bf16.gmra.mxu3 %v1509_v28  ;;  %v1395_v5 = vsel %vm3598_vm13, %v3560_v9, %v1391_v56 }
 0x169   : > { %v2631_v10 = vpop.eup %2630  ;;  %2634 = vrcp.f32 %v3615_v46  ;;  %v1445_v35 = vmul.f32 %v1160_v7, %v3401_v58  ;;  %v1165_v29 = vmul.f32 %v3588_v55, %v1164_v8  ;;  %v1460_v30 = vmul.f32 %v1385_v54, %v3355_v51 }
 0x16a   : > { %v1405_v27 = vmul.f32 %v3594_v12, %v1404_v32  ;;  %v3631_v14 = vadd.f32 1.0, %v2631_v10  ;;  %vm1407_vm0 = vweird.f32 %v3537_v44  ;;  %v1411_v1 = vand.u32 2147483647, %v3537_v44 }
 0x16b   : > { %v753_v37 = vpop.f32.mrf.mxu1  ;;  %v1413_v22 = vand.u32 2147483648, %v3537_v44  ;;  %v1477_v9 = vadd.f32 %v1445_v35, %v3480_v17  ;;  %v1400_v58 = vsel %vm3570_vm9, %v1399_v52, %v1395_v5  ;;  %vm1408_vm1 = vweird.f32 %v3594_v12 }
 0x16c   : > { %v1476_v36 = vadd.f32 %v1444_v4, %v3433_v24  ;;  %2636 = vrcp.f32 %v3631_v14  ;;  %v1166_v50 = vadd.f32 %v3588_v55, %v1165_v29  ;;  %vm1168_vm2 = vweird.f32 %v3588_v55  ;;  %vm3658_vm3 = vmor %vm1407_vm0, %vm1408_vm1 }
 0x16d   : > { %v2633_v51 = vpop.eup %2632  ;;  %v1171_v54 = vand.u32 2147483647, %v3532_v13  ;;  %v1173_v6 = vand.u32 2147483648, %v3532_v13  ;;  %v3647_v17 = vadd.f32 %v3594_v12, %v1405_v27  ;;  %v1426_v42 = vand.u32 2147483647, %v3631_v14 }
 0x16e   : > { %v3650_v38 = vadd.f32 1.0, %v2633_v51  ;;  %v3653_v24 = vadd.f32 %v3583_v21, %v750_v39  ;;  %v1461_v41 = vmul.f32 %v1400_v58, %v3431_v16  ;;  %vm3662_vm4 = vcmp.eq.f32.partialorder %v1411_v1, 8.507059e+37 }
 0x16f   : > { %v2635_v47 = vpop.eup %2634  ;;  %v1414_v11 = vor.u32 1.1754944e-38, %v1413_v22  ;;  %vm1167_vm5 = vweird.f32 %v3532_v13  ;;  %v1502_v53 = vpack.c.bf16 %v1477_v9, %v1476_v36  ;;  %vm1422_vm6 = vweird.f32 %v3631_v14  ;;  %v3743_v33 = vpop.f32.mrf.mxu0 }
 0x170   : > { %v1428_v39 = vand.u32 2147483648, %v3631_v14  ;;  %2638 = vrcp.f32 %v3650_v38  ;;  %vm3672_vm7 = vmor %vm1167_vm5, %vm1168_vm2  ;;  %v2151_v44 = vmul.f32 -1.442695, %v3653_v24  ;;  %vm3680_vm8 = vcmp.eq.f32.partialorder %v1171_v54, 8.507059e+37 }
 0x171   : > { %v1170_v48 = vsel %vm3672_vm7, %v3588_v55, %v1166_v50  ;;  %v1174_v57 = vor.u32 1.1754944e-38, %v1173_v6  ;;  %1618 = vmatmul.bf16.gmra.mxu2 %v1502_v53  ;;  %v1178_v62 = vmul.f32 %v2635_v47, %v3615_v46  ;;  %v1410_v23 = vsel %vm3658_vm3, %v3594_v12, %v3647_v17 }
 0x172   : > { %v2637_v43 = vpop.eup %2636  ;;  %vm3689_vm9 = vcmp.eq.f32.partialorder %v1426_v42, 8.507059e+37  ;;  %2640 = vpow2.f32 %v2151_v44  ;;  %v3694_v55 = vadd.f32 %v3583_v21, %v753_v37  ;;  %vm1183_vm10 = vweird.f32 %v2635_v47 }
 0x173   : > { %v755_v60 = vpop.f32.mrf.mxu1  ;;  %v1418_v56 = vmul.f32 %v2637_v43, %v3631_v14  ;;  %v1179_v3 = vsub.f32 1.0, %v1178_v62  ;;  %v1186_v59 = vand.u32 2147483647, %v3615_v46  ;;  %v1188_v28 = vand.u32 2147483648, %v3615_v46 }
 0x174   : > { %v2152_v12 = vmul.f32 -1.442695, %v3694_v55  ;;  %v1492_v63 = vadd.f32 %v1460_v30, %v3140_v61  ;;  %v1493_v8 = vadd.f32 %v1461_v41, %v3157_v20  ;;  %vm1423_vm11 = vweird.f32 %v2637_v43 }
 0x175   : > { %v1419_v52 = vsub.f32 1.0, %v1418_v56  ;;  %v1175_v32 = vsel %vm3680_vm8, %v1174_v57, %v1170_v48  ;;  %v1180_v4 = vmul.f32 %v2635_v47, %v1179_v3  ;;  %vm1182_vm12 = vweird.f32 %v3615_v46  ;;  %vm3721_vm14 = vmor %vm1422_vm6, %vm1423_vm11 }
 0x176   : > { %v3706_v7 = vpop.eup %2638  ;;  %2642 = vpow2.f32 %v2152_v12  ;;  %v1510_v10 = vpack.c.bf16 %v1493_v8, %v1492_v63  ;;  %v3710_v5 = vadd.f32 %v3583_v21, %v755_v60  ;;  %v1429_v29 = vor.u32 1.1754944e-38, %v1428_v39  ;;  %vm3713_vm13 = vmor %vm1182_vm12, %vm1183_vm10 }
 0x177   : > { %v1420_v35 = vmul.f32 %v2637_v43, %v1419_v52  ;;  %v1181_v61 = vadd.f32 %v2635_v47, %v1180_v4  ;;  %v1193_v37 = vmul.f32 %v3706_v7, %v3650_v38  ;;  %v1446_v27 = vmul.f32 %v1175_v32, %v3458_v34  ;;  %v3779_v32 = vpop.f32.mrf.mxu0 }
 0x178   : > { %v2641_v30 = vpop.eup %2640  ;;  %vm1187_vm15 = vcmp.eq.f32.partialorder %v1186_v59, 8.507059e+37  ;;  %v1189_v1 = vor.u32 1.1754944e-38, %v1188_v28  ;;  %1658 = vmatmul.bf16.gmra.mxu3 %v1510_v10  ;;  %v2153_v22 = vmul.f32 -1.442695, %v3710_v5  ;;  %v1415_v14 = vsel %vm3662_vm4, %v1414_v11, %v1410_v23 }
 0x179   : > { %v1421_v9 = vadd.f32 %v2637_v43, %v1420_v35  ;;  %v3727_v58 = vadd.f32 1.0, %v2641_v30  ;;  %v1185_v36 = vsel %vm3713_vm13, %v2635_v47, %v1181_v61  ;;  %v1194_v51 = vsub.f32 1.0, %v1193_v37 }
 0x17a   : > { %v1190_v54 = vsel %vm1187_vm15, %v1189_v1, %v1185_v36  ;;  %2644 = vpow2.f32 %v2153_v22  ;;  %v1478_v11 = vadd.f32 %v1446_v27, %v3558_v31  ;;  %v1462_v16 = vmul.f32 %v1415_v14, %v3461_v15 }
 0x17b   : > { %v758_v50 = vpop.f32.mrf.mxu1  ;;  %v1425_v6 = vsel %vm3721_vm14, %v2637_v43, %v1421_v9  ;;  %2646 = vrcp.f32 %v3727_v58  ;;  %v1447_v17 = vmul.f32 %v1190_v54, %v3528_v19  ;;  %v1195_v42 = vmul.f32 %v3706_v7, %v1194_v51 }
 0x17c   : > { %v3734_v34 = vadd.f32 %v3583_v21, %v758_v50  ;;  %v2643_v47 = vpop.eup %2642  ;;  %v1430_v41 = vsel %vm3689_vm9, %v1429_v29, %v1425_v6  ;;  %vm1198_vm0 = vweird.f32 %v3706_v7  ;;  %v1203_v48 = vand.u32 2147483648, %v3650_v38 }
 0x17d   : > { %v1463_v2 = vmul.f32 %v1430_v41, %v3547_v25  ;;  %v1479_v53 = vadd.f32 %v1447_v17, %v3621_v49  ;;  %v3748_v39 = vadd.f32 1.0, %v2643_v47  ;;  %v1196_v19 = vadd.f32 %v3706_v7, %v1195_v42  ;;  %v3807_v17 = vld [vmem:[%s384_s14] ss:$0 sm:$0xff] }
 0x17e   : > { %v2154_v44 = vmul.f32 -1.442695, %v3734_v34  ;;  %vm1197_vm1 = vweird.f32 %v3650_v38  ;;  %v1201_v31 = vand.u32 2147483647, %v3650_v38  ;;  %v1494_v38 = vadd.f32 %v1462_v16, %v3166_v45 }
 0x17f   : > { %2648 = vrcp.f32 %v3748_v39  ;;  %v1503_v13 = vpack.c.bf16 %v1479_v53, %v1478_v11  ;;  %v1495_v49 = vadd.f32 %v1463_v2, %v3187_v0  ;;  %vm3759_vm2 = vmor %vm1197_vm1, %vm1198_vm0  ;;  %v1204_v0 = vor.u32 1.1754944e-38, %v1203_v48 }
 0x180   : > { %v2645_v25 = vpop.eup %2644  ;;  %2650 = vpow2.f32 %v2154_v44  ;;  %v1200_v43 = vsel %vm3759_vm2, %v3706_v7, %v1196_v19  ;;  %vm1202_vm3 = vcmp.eq.f32.partialorder %v1201_v31, 8.507059e+37  ;;  %v1216_v63 = vand.u32 2147483647, %v3727_v58  ;;  %v3784_v7 = vld [vmem:[%s3056_s20] sm:$0xff]   ;;  %v666_v44 = vpop.f32.mrf.mxu0 }
 0x181   : > { %v2647_v15 = vpop.eup %2646  ;;  %v3763_v62 = vadd.f32 1.0, %v2645_v25  ;;  %1623 = vmatmul.bf16.gmra.mxu2 %v1503_v13  ;;  %v1511_v3 = vpack.c.bf16 %v1495_v49, %v1494_v38  ;;  %v1205_v12 = vsel %vm1202_vm3, %v1204_v0, %v1200_v43  ;;  %v1218_v8 = vand.u32 2147483648, %v3727_v58 }
 0x182   : > { %v1208_v23 = vmul.f32 %v2647_v15, %v3727_v58  ;;  %vm1213_vm4 = vweird.f32 %v2647_v15  ;;  %v1448_v35 = vmul.f32 %v1205_v12, %v3586_v18  ;;  %vm1212_vm5 = vweird.f32 %v3727_v58 }
 0x183   : > { %v760_v60 = vpop.f32.mrf.mxu1  ;;  %2652 = vrcp.f32 %v3763_v62  ;;  %vm1214_vm6 = vmor %vm1212_vm5, %vm1213_vm4  ;;  %v1219_v37 = vor.u32 1.1754944e-38, %v1218_v8  ;;  %v2248_v27 = vunpack.c.l.bf16 %v3784_v7  ;;  %vm1217_vm7 = vcmp.eq.f32.partialorder %v1216_v63, 8.507059e+37 }
 0x184   : > { %v3771_v26 = vadd.f32 %v3583_v21, %v760_v60  ;;  %v1209_v56 = vsub.f32 1.0, %v1208_v23  ;;  %vm1227_vm8 = vweird.f32 %v3748_v39  ;;  %v1231_v58 = vand.u32 2147483647, %v3748_v39 }
 0x185   : > { %v3775_v28 = vpop.eup %2648  ;;  %v1480_v50 = vadd.f32 %v1448_v35, %v3696_v40  ;;  %v1246_v6 = vand.u32 2147483647, %v3763_v62  ;;  %v1248_v47 = vand.u32 2147483648, %v3763_v62  ;;  %v1233_v53 = vand.u32 2147483648, %v3748_v39 }
 0x186   : > { %v2155_v59 = vmul.f32 -1.442695, %v3771_v26  ;;  %v2651_v45 = vpop.eup %2650  ;;  %v1210_v52 = vmul.f32 %v2647_v15, %v1209_v56  ;;  %v1223_v4 = vmul.f32 %v3775_v28, %v3748_v39  ;;  %vm1228_vm9 = vweird.f32 %v3775_v28 }
 0x187   : > { %v3786_v10 = vadd.f32 1.0, %v2651_v45  ;;  %vm1242_vm11 = vweird.f32 %v3763_v62  ;;  %v2249_v16 = vunpack.c.h.bf16 %v3784_v7  ;;  %vm3824_vm12 = vmor %vm1227_vm8, %vm1228_vm9  ;;  %vm1247_vm14 = vcmp.eq.f32.partialorder %v1246_v6, 8.507059e+37 }
 0x188   : > { %2654 = vpow2.f32 %v2155_v59  ;;  %v1211_v29 = vadd.f32 %v2647_v15, %v1210_v52  ;;  %1663 = vmatmul.bf16.gmra.mxu3 %v1511_v3  ;;  %v1224_v61 = vsub.f32 1.0, %v1223_v4  ;;  %v1249_v25 = vor.u32 1.1754944e-38, %v1248_v47 }
 0x189   : > { %v2653_v20 = vpop.eup %2652  ;;  %2656 = vrcp.f32 %v3786_v10  ;;  %v1234_v43 = vor.u32 1.1754944e-38, %v1233_v53  ;;  %vm1232_vm15 = vcmp.eq.f32.partialorder %v1231_v58, 8.507059e+37  ;;  %vm1257_vm3 = vweird.f32 %v3786_v10 }
 0x18a   : > { %v1215_v1 = vsel %vm1214_vm6, %v2647_v15, %v1211_v29  ;;  %v1225_v22 = vmul.f32 %v3775_v28, %v1224_v61  ;;  %v1238_v18 = vmul.f32 %v2653_v20, %v3763_v62  ;;  %vm1243_vm10 = vweird.f32 %v2653_v20  ;;  %v669_v61 = vpop.f32.mrf.mxu0 }
 0x18b   : > { %v763_v30 = vpop.f32.mrf.mxu1  ;;  %v1589_v46 = vpop.f32.mrf.mxu2  ;;  %v1220_v9 = vsel %vm1217_vm7, %v1219_v37, %v1215_v1  ;;  %vm1244_vm13 = vmor %vm1242_vm11, %vm1243_vm10 }
 0x18c   : > { %v3797_v36 = vadd.f32 %v3583_v21, %v763_v30  ;;  %v1449_v14 = vmul.f32 %v1220_v9, %v3653_v24  ;;  %v1239_v54 = vsub.f32 1.0, %v1238_v18  ;;  %v1226_v24 = vadd.f32 %v3775_v28, %v1225_v22 }
 0x18d   : > { %v1590_v13 = vadd.f32 %v3807_v17, %v1589_v46  ;;  %v2390_v46 = vld [vmem:[%s3056_s20 + $0x8] sm:$0xff]  }
 0x18e   : > { %v2655_v51 = vpop.eup %2654  ;;  %v2156_v41 = vmul.f32 -1.442695, %v3797_v36  ;;  %v1481_v40 = vadd.f32 %v1449_v14, %v3743_v33  ;;  %v1240_v2 = vmul.f32 %v2653_v20, %v1239_v54  ;;  %v1230_v39 = vsel %vm3824_vm12, %v3775_v28, %v1226_v24 }
 0x18f   : > { %v3810_v42 = vadd.f32 1.0, %v2655_v51  ;;  %v3816_v11 = vpop.eup %2656  ;;  %v1733_v38 = vadd.f32 %v2248_v27, %v1590_v13  ;;  %v1235_v59 = vsel %vm1232_vm15, %v1234_v43, %v1230_v39  ;;  %v2252_v51 = vunpack.c.l.bf16 %v2390_v46 }
 0x190   : > { %v1504_v33 = vpack.c.bf16 %v1481_v40, %v1480_v50  ;;  %v1241_v48 = vadd.f32 %v2653_v20, %v1240_v2  ;;  %v1253_v31 = vmul.f32 %v3816_v11, %v3786_v10  ;;  %v1450_v52 = vmul.f32 %v1235_v59, %v3694_v55 }
 0x191   : > { %2658 = vrcp.f32 %v3810_v42  ;;  %vm1272_vm1 = vweird.f32 %v3810_v42  ;;  %v1278_v27 = vand.u32 2147483648, %v3810_v42  ;;  %vm1258_vm2 = vweird.f32 %v3816_v11 }
 0x192   : > { %2660 = vpow2.f32 %v2156_v41  ;;  %1628 = vmatmul.bf16.gmra.mxu2 %v1504_v33  ;;  %v1245_v57 = vsel %vm1244_vm13, %v2653_v20, %v1241_v48  ;;  %v1254_v12 = vsub.f32 1.0, %v1253_v31  ;;  %v1482_v37 = vadd.f32 %v1450_v52, %v3779_v32  ;;  %vm1259_vm5 = vmor %vm1257_vm3, %vm1258_vm2 }
 0x193   : > { %v765_v49 = vpop.f32.mrf.mxu1  ;;  %v1591_v15 = vpop.f32.mrf.mxu2  ;;  %v1250_v23 = vsel %vm1247_vm14, %v1249_v25, %v1245_v57  ;;  %v1276_v18 = vand.u32 2147483647, %v3810_v42  ;;  %v1263_v32 = vand.u32 2147483648, %v3786_v10  ;;  %v1261_v50 = vand.u32 2147483647, %v3786_v10 }
 0x194   : > { %v3835_v62 = vadd.f32 %v3583_v21, %v765_v49  ;;  %v1592_v60 = vadd.f32 %v3807_v17, %v1591_v15  ;;  %v1451_v28 = vmul.f32 %v1250_v23, %v3710_v5  ;;  %v1255_v5 = vmul.f32 %v3816_v11, %v1254_v12  ;;  %v2402_v12 = vld [vmem:[%s3056_s20 + $0x68] sm:$0xff]  }
 0x195   : > { %v2253_v6 = vunpack.c.h.bf16 %v2390_v46  ;;  %vm1277_vm6 = vcmp.eq.f32.partialorder %v1276_v18, 8.507059e+37  ;;  %v1264_v10 = vor.u32 1.1754944e-38, %v1263_v32  ;;  %vm1262_vm7 = vcmp.eq.f32.partialorder %v1261_v50, 8.507059e+37  ;;  %v2392_v32 = vld [vmem:[%s3056_s20 + $0x18] sm:$0xff]  }
 0x196   : > { %v2157_v0 = vmul.f32 -1.442695, %v3835_v62  ;;  %v1734_v56 = vadd.f32 %v2249_v16, %v1592_v60  ;;  %v1483_v35 = vadd.f32 %v1451_v28, %v666_v44  ;;  %v1256_v1 = vadd.f32 %v3816_v11, %v1255_v5  ;;  %v671_v44 = vpop.f32.mrf.mxu0 }
 0x197   : > { %v2659_v3 = vpop.eup %2658  ;;  %v2261_v50 = vunpack.c.h.bf16 %v2392_v32 }
 0x198   : > { %v2661_v63 = vpop.eup %2660  ;;  %2662 = vpow2.f32 %v2157_v0  ;;  %v2313_v8 = vpack.c.bf16 %v1734_v56, %v1733_v38  ;;  %v1268_v21 = vmul.f32 %v2659_v3, %v3810_v42  ;;  %vm1273_vm0 = vweird.f32 %v2659_v3  ;;  %v2391_v38 = vld [vmem:[%s3056_s20 + $0x10] sm:$0xff]  }
 0x199   : > { %v3841_v45 = vadd.f32 1.0, %v2661_v63  ;;  %v1505_v22 = vpack.c.bf16 %v1483_v35, %v1482_v37  ;;  %vm3864_vm4 = vmor %vm1272_vm1, %vm1273_vm0  ;;  %v1279_v42 = vor.u32 1.1754944e-38, %v1278_v27  ;;  %v1260_v41 = vsel %vm1259_vm5, %v3816_v11, %v1256_v1 }
 0x19a   : > { %2314 = vst [vmem:[%s3845_s8] sm:$0xff] %v2313_v8   ;;  %v1269_v4 = vsub.f32 1.0, %v1268_v21  ;;  %v1265_v33 = vsel %vm1262_vm7, %v1264_v10, %v1260_v41  ;;  %v2256_v63 = vunpack.c.l.bf16 %v2391_v38  ;;  %v2257_v28 = vunpack.c.h.bf16 %v2391_v38  ;;  %v2393_v41 = vld [vmem:[%s3056_s20 + $0x20] sm:$0xff]  }
 0x19b   : > { %2664 = vrcp.f32 %v3841_v45  ;;  %v1594_v7 = vpop.f32.mrf.mxu2  ;;  %v1452_v31 = vmul.f32 %v1265_v33, %v3734_v34  ;;  %v1293_v59 = vand.u32 2147483648, %v3841_v45  ;;  %vm1287_vm12 = vweird.f32 %v3841_v45 }
 0x19c   : > { %v1270_v29 = vmul.f32 %v2659_v3, %v1269_v4  ;;  %v1595_v54 = vadd.f32 %v3807_v17, %v1594_v7  ;;  %v1291_v8 = vand.u32 2147483647, %v3841_v45  ;;  %v2264_v10 = vunpack.c.l.bf16 %v2393_v41 }
 0x19d   : > { %v1484_v43 = vadd.f32 %v1452_v31, %v669_v61 }
 0x19e   : > { %v2663_v20 = vpop.eup %2662  ;;  %v1271_v30 = vadd.f32 %v2659_v3, %v1270_v29  ;;  %v1735_v53 = vadd.f32 %v2252_v51, %v1595_v54  ;;  %v1294_v29 = vor.u32 1.1754944e-38, %v1293_v59  ;;  %vm1292_vm15 = vcmp.eq.f32.partialorder %v1291_v8, 8.507059e+37 }
 0x19f   : > { %v3852_v55 = vadd.f32 1.0, %v2663_v20  ;;  %v2260_v51 = vunpack.c.l.bf16 %v2392_v32  ;;  %v2301_v8 = vunpack.c.h.bf16 %v2402_v12 }
 0x1a0   : > { %v1275_v14 = vsel %vm3864_vm4, %v2659_v3, %v1271_v30  ;;  %v674_v3 = vpop.f32.mrf.mxu0 }
 0x1a1   : > { %v3859_v9 = vpop.eup %2664  ;;  %2666 = vrcp.f32 %v3852_v55  ;;  %v1280_v2 = vsel %vm1277_vm6, %v1279_v42, %v1275_v14  ;;  %vm1302_vm9 = vweird.f32 %v3852_v55  ;;  %v1306_v56 = vand.u32 2147483647, %v3852_v55 }
 0x1a2   : > { %1633 = vmatmul.bf16.gmra.mxu2 %v1505_v22  ;;  %v1283_v40 = vmul.f32 %v3859_v9, %v3841_v45  ;;  %v1453_v48 = vmul.f32 %v1280_v2, %v3771_v26  ;;  %v1308_v26 = vand.u32 2147483648, %v3852_v55  ;;  %vm1288_vm10 = vweird.f32 %v3859_v9 }
 0x1a3   : > { %v1596_v47 = vpop.f32.mrf.mxu2  ;;  %vm1289_vm13 = vmor %vm1287_vm12, %vm1288_vm10  ;;  %vm1307_vm14 = vcmp.eq.f32.partialorder %v1306_v56, 8.507059e+37  ;;  %v2265_v2 = vunpack.c.h.bf16 %v2393_v41 }
 0x1a4   : > { %v1597_v24 = vadd.f32 %v3807_v17, %v1596_v47  ;;  %v1284_v11 = vsub.f32 1.0, %v1283_v40  ;;  %v1485_v39 = vadd.f32 %v1453_v48, %v671_v44  ;;  %v1309_v4 = vor.u32 1.1754944e-38, %v1308_v26  ;;  %v2401_v40 = vld [vmem:[%s3056_s20 + $0x60] sm:$0xff]  }
 0x1a5   : > { %v2297_v33 = vunpack.c.h.bf16 %v2401_v40 }
 0x1a6   : > { %v1736_v16 = vadd.f32 %v2253_v6, %v1597_v24  ;;  %v1285_v57 = vmul.f32 %v3859_v9, %v1284_v11  ;;  %v1506_v34 = vpack.c.bf16 %v1485_v39, %v1484_v43 }
 0x1a7   : > { %v2667_v19 = vpop.eup %2666 }
 0x1a8   : > { %v2318_v13 = vpack.c.bf16 %v1736_v16, %v1735_v53  ;;  %v1298_v25 = vmul.f32 %v2667_v19, %v3852_v55  ;;  %vm1303_vm8 = vweird.f32 %v2667_v19  ;;  %v1286_v0 = vadd.f32 %v3859_v9, %v1285_v57  ;;  %v676_v27 = vpop.f32.mrf.mxu0 }
 0x1a9   : > { %vm3888_vm11 = vmor %vm1302_vm9, %vm1303_vm8  ;;  %v2296_v16 = vunpack.c.l.bf16 %v2401_v40 }
 0x1aa   : > { %2405 = vst [vmem:[%s3845_s8 + $0x8] sm:$0xff] %v2318_v13   ;;  %v1299_v49 = vsub.f32 1.0, %v1298_v25  ;;  %v1290_v35 = vsel %vm1289_vm13, %v3859_v9, %v1286_v0 }
 0x1ab   : > { %v1599_v15 = vpop.f32.mrf.mxu2  ;;  %v1295_v37 = vsel %vm1292_vm15, %v1294_v29, %v1290_v35  ;;  %v2395_v29 = vld [vmem:[%s3056_s20 + $0x30] sm:$0xff]  }
 0x1ac   : > { %v1300_v60 = vmul.f32 %v2667_v19, %v1299_v49  ;;  %v1600_v52 = vadd.f32 %v3807_v17, %v1599_v15  ;;  %v1454_v55 = vmul.f32 %v1295_v37, %v3797_v36  ;;  %v2273_v37 = vunpack.c.h.bf16 %v2395_v29 }
 0x1ae   : > { %v1301_v23 = vadd.f32 %v2667_v19, %v1300_v60  ;;  %v1737_v45 = vadd.f32 %v2256_v63, %v1600_v52  ;;  %v1486_v18 = vadd.f32 %v1454_v55, %v674_v3  ;;  %v2394_v60 = vld [vmem:[%s3056_s20 + $0x28] sm:$0xff]  }
 0x1af   : > { %v2269_v38 = vunpack.c.h.bf16 %v2394_v60 }
 0x1b0   : > { %v1305_v21 = vsel %vm3888_vm11, %v2667_v19, %v1301_v23  ;;  %v2268_v23 = vunpack.c.l.bf16 %v2394_v60 }
 0x1b1   : > { %v1310_v61 = vsel %vm1307_vm14, %v1309_v4, %v1305_v21 }
 0x1b2   : > { %1638 = vmatmul.bf16.gmra.mxu2 %v1506_v34  ;;  %v1455_v30 = vmul.f32 %v1310_v61, %v3835_v62 }
 0x1b3   : > { %v1601_v7 = vpop.f32.mrf.mxu2 }
 0x1b4   : > { %v1602_v5 = vadd.f32 %v3807_v17, %v1601_v7  ;;  %v1487_v1 = vadd.f32 %v1455_v30, %v676_v27  ;;  %v2403_v27 = vld [vmem:[%s3056_s20 + $0x70] sm:$0xff]  }
 0x1b5   : > { %v2305_v32 = vunpack.c.h.bf16 %v2403_v27 }
 0x1b6   : > { %v1738_v20 = vadd.f32 %v2257_v28, %v1602_v5  ;;  %v1507_v9 = vpack.c.bf16 %v1487_v1, %v1486_v18  ;;  %v2300_v28 = vunpack.c.l.bf16 %v2402_v12 }
 0x1b8   : > { %v2323_v46 = vpack.c.bf16 %v1738_v20, %v1737_v45  ;;  %v2272_v45 = vunpack.c.l.bf16 %v2395_v29 }
 0x1ba   : > { %2406 = vst [vmem:[%s3845_s8 + $0x10] sm:$0xff] %v2323_v46  }
 0x1bb   : > { %v1604_v22 = vpop.f32.mrf.mxu2 }
 0x1bc   : > { %v1605_v58 = vadd.f32 %v3807_v17, %v1604_v22 }
 0x1be   : > { %v1739_v54 = vadd.f32 %v2260_v51, %v1605_v58 }
 0x1c2   : > { %1643 = vmatmul.bf16.gmra.mxu2 %v1507_v9  ;;  %v2304_v9 = vunpack.c.l.bf16 %v2403_v27 }
 0x1c3   : > { %v1606_v14 = vpop.f32.mrf.mxu2 }
 0x1c4   : > { %v1607_v62 = vadd.f32 %v3807_v17, %v1606_v14 }
 0x1c6   : > { %v1740_v36 = vadd.f32 %v2261_v50, %v1607_v62 }
 0x1c8   : > { %v2328_v6 = vpack.c.bf16 %v1740_v36, %v1739_v54  ;;  %v2396_v36 = vld [vmem:[%s3056_s20 + $0x38] sm:$0xff]  }
 0x1c9   : > { %v2277_v41 = vunpack.c.h.bf16 %v2396_v36 }
 0x1ca   : > { %2407 = vst [vmem:[%s3845_s8 + $0x18] sm:$0xff] %v2328_v6  }
 0x1ce   : > { %v1609_v42 = vpop.f32.mrf.mxu2 }
 0x1cf   : > { %v1610_v24 = vadd.f32 %v3807_v17, %v1609_v42  ;;  %v2276_v42 = vunpack.c.l.bf16 %v2396_v36 }
 0x1d0   : > { %v1649_v47 = vpop.f32.mrf.mxu3 }
 0x1d1   : > { %v1650_v53 = vadd.f32 %v3807_v17, %v1649_v47  ;;  %v1741_v13 = vadd.f32 %v2264_v10, %v1610_v24 }
 0x1d3   : > { %v1757_v31 = vadd.f32 %v2296_v16, %v1650_v53 }
 0x1d6   : > { %v1611_v19 = vpop.f32.mrf.mxu2 }
 0x1d7   : > { %v1612_v44 = vadd.f32 %v3807_v17, %v1611_v19 }
 0x1d8   : > { %v1651_v48 = vpop.f32.mrf.mxu3 }
 0x1d9   : > { %v1652_v11 = vadd.f32 %v3807_v17, %v1651_v48  ;;  %v1742_v25 = vadd.f32 %v2265_v2, %v1612_v44  ;;  %v2404_v2 = vld [vmem:[%s3056_s20 + $0x78] sm:$0xff]  }
 0x1da   : > { %v2309_v44 = vunpack.c.h.bf16 %v2404_v2 }
 0x1db   : > { %v1758_v49 = vadd.f32 %v2297_v33, %v1652_v11  ;;  %v2333_v15 = vpack.c.bf16 %v1742_v25, %v1741_v13  ;;  %v2308_v33 = vunpack.c.l.bf16 %v2404_v2 }
 0x1dd   : > { %v2373_v39 = vpack.c.bf16 %v1758_v49, %v1757_v31  ;;  %2408 = vst [vmem:[%s3845_s8 + $0x20] sm:$0xff] %v2333_v15   ;;  %v2397_v15 = vld [vmem:[%s3056_s20 + $0x40] sm:$0xff]  }
 0x1de   : > { %v2281_v60 = vunpack.c.h.bf16 %v2397_v15 }
 0x1df   : > { %2416 = vst [vmem:[%s3845_s8 + $0x60] sm:$0xff] %v2373_v39  }
 0x1e0   : > { %v1614_v57 = vpop.f32.mrf.mxu2 }
 0x1e1   : > { %v1615_v43 = vadd.f32 %v3807_v17, %v1614_v57  ;;  %v2280_v57 = vunpack.c.l.bf16 %v2397_v15 }
 0x1e3   : > { %v1743_v34 = vadd.f32 %v2268_v23, %v1615_v43 }
 0x1e8   : > { %v1616_v26 = vpop.f32.mrf.mxu2 }
 0x1e9   : > { %v1617_v0 = vadd.f32 %v3807_v17, %v1616_v26 }
 0x1eb   : > { %v1654_v56 = vpop.f32.mrf.mxu3  ;;  %v1744_v3 = vadd.f32 %v2269_v38, %v1617_v0 }
 0x1ec   : > { %v1655_v63 = vadd.f32 %v3807_v17, %v1654_v56  ;;  %v2398_v56 = vld [vmem:[%s3056_s20 + $0x48] sm:$0xff]  }
 0x1ed   : > { %v2338_v59 = vpack.c.bf16 %v1744_v3, %v1743_v34  ;;  %v2285_v12 = vunpack.c.h.bf16 %v2398_v56 }
 0x1ee   : > { %v1759_v7 = vadd.f32 %v2300_v28, %v1655_v63 }
 0x1ef   : > { %2409 = vst [vmem:[%s3845_s8 + $0x28] sm:$0xff] %v2338_v59   ;;  %v2284_v59 = vunpack.c.l.bf16 %v2398_v56 }
 0x1f3   : > { %v1656_v21 = vpop.f32.mrf.mxu3 }
 0x1f4   : > { %v1657_v52 = vadd.f32 %v3807_v17, %v1656_v21  ;;  %v1619_v4 = vpop.f32.mrf.mxu2 }
 0x1f5   : > { %v1620_v61 = vadd.f32 %v3807_v17, %v1619_v4 }
 0x1f6   : > { %v1760_v35 = vadd.f32 %v2301_v8, %v1657_v52 }
 0x1f7   : > { %v1745_v55 = vadd.f32 %v2272_v45, %v1620_v61 }
 0x1f8   : > { %v2378_v5 = vpack.c.bf16 %v1760_v35, %v1759_v7  ;;  %v2399_v7 = vld [vmem:[%s3056_s20 + $0x50] sm:$0xff]  }
 0x1f9   : > { %v2289_v29 = vunpack.c.h.bf16 %v2399_v7 }
 0x1fa   : > { %2417 = vst [vmem:[%s3845_s8 + $0x68] sm:$0xff] %v2378_v5   ;;  %v2288_v5 = vunpack.c.l.bf16 %v2399_v7 }
 0x1fb   : > { %v1659_v20 = vpop.f32.mrf.mxu3 }
 0x1fc   : > { %v1621_v30 = vpop.f32.mrf.mxu2  ;;  %v1660_v18 = vadd.f32 %v3807_v17, %v1659_v20 }
 0x1fd   : > { %v1622_v46 = vadd.f32 %v3807_v17, %v1621_v30 }
 0x1fe   : > { %v1761_v14 = vadd.f32 %v2304_v9, %v1660_v18 }
 0x1ff   : > { %v1746_v1 = vadd.f32 %v2273_v37, %v1622_v46 }
 0x201   : > { %v2343_v22 = vpack.c.bf16 %v1746_v1, %v1745_v55  ;;  %v2400_v55 = vld [vmem:[%s3056_s20 + $0x58] sm:$0xff]  }
 0x202   : > { %v2292_v1 = vunpack.c.l.bf16 %v2400_v55 }
 0x203   : > { %2410 = vst [vmem:[%s3845_s8 + $0x30] sm:$0xff] %v2343_v22   ;;  %v1661_v58 = vpop.f32.mrf.mxu3  ;;  %v2293_v22 = vunpack.c.h.bf16 %v2400_v55 }
 0x204   : > { %v1662_v51 = vadd.f32 %v3807_v17, %v1661_v58  ;;  %v1624_v50 = vpop.f32.mrf.mxu2 }
 0x205   : > { %v1625_v6 = vadd.f32 %v3807_v17, %v1624_v50 }
 0x206   : > { %v1762_v62 = vadd.f32 %v2305_v32, %v1662_v51 }
 0x207   : > { %v1747_v10 = vadd.f32 %v2276_v42, %v1625_v6 }
 0x208   : > { %v2383_v54 = vpack.c.bf16 %v1762_v62, %v1761_v14 }
 0x20a   : > { %2418 = vst [vmem:[%s3845_s8 + $0x70] sm:$0xff] %v2383_v54  }
 0x20b   : > { %v1664_v47 = vpop.f32.mrf.mxu3 }
 0x20c   : > { %v1626_v40 = vpop.f32.mrf.mxu2  ;;  %v1665_v19 = vadd.f32 %v3807_v17, %v1664_v47 }
 0x20d   : > { %v1627_v24 = vadd.f32 %v3807_v17, %v1626_v40 }
 0x20e   : > { %v1763_v25 = vadd.f32 %v2308_v33, %v1665_v19 }
 0x20f   : > { %v1748_v53 = vadd.f32 %v2277_v41, %v1627_v24 }
 0x211   : > { %v2348_v16 = vpack.c.bf16 %v1748_v53, %v1747_v10 }
 0x213   : > { %2411 = vst [vmem:[%s3845_s8 + $0x38] sm:$0xff] %v2348_v16   ;;  %v1666_v48 = vpop.f32.mrf.mxu3 }
 0x214   : > { %v1667_v11 = vadd.f32 %v3807_v17, %v1666_v48 }
 0x215   : > { %v1629_v13 = vpop.f32.mrf.mxu2 }
 0x216   : > { %v1764_v31 = vadd.f32 %v2309_v44, %v1667_v11  ;;  %v1630_v39 = vadd.f32 %v3807_v17, %v1629_v13 }
 0x218   : > { %v2388_v49 = vpack.c.bf16 %v1764_v31, %v1763_v25  ;;  %v1749_v38 = vadd.f32 %v2280_v57, %v1630_v39 }
 0x21a   : > { %2419 = vst [vmem:[%s3845_s8 + $0x78] sm:$0xff] %v2388_v49  }
 0x21d   : > { %v1631_v43 = vpop.f32.mrf.mxu2 }
 0x21e   : > { %v1632_v23 = vadd.f32 %v3807_v17, %v1631_v43 }
 0x220   : > { %v1750_v26 = vadd.f32 %v2281_v60, %v1632_v23 }
 0x222   : > { %v2353_v0 = vpack.c.bf16 %v1750_v26, %v1749_v38 }
 0x224   : > { %2412 = vst [vmem:[%s3845_s8 + $0x40] sm:$0xff] %v2353_v0  }
 0x225   : > { %v1634_v34 = vpop.f32.mrf.mxu2 }
 0x226   : > { %v1635_v3 = vadd.f32 %v3807_v17, %v1634_v34 }
 0x228   : > { %v1751_v8 = vadd.f32 %v2284_v59, %v1635_v3 }
 0x22d   : > { %v1636_v63 = vpop.f32.mrf.mxu2 }
 0x22e   : > { %v1637_v28 = vadd.f32 %v3807_v17, %v1636_v63 }
 0x230   : > { %v1752_v21 = vadd.f32 %v2285_v12, %v1637_v28 }
 0x232   : > { %v2358_v52 = vpack.c.bf16 %v1752_v21, %v1751_v8 }
 0x234   : > { %2413 = vst [vmem:[%s3845_s8 + $0x48] sm:$0xff] %v2358_v52  }
 0x235   : > { %v1639_v4 = vpop.f32.mrf.mxu2 }
 0x236   : > { %v1640_v35 = vadd.f32 %v3807_v17, %v1639_v4 }
 0x238   : > { %v1753_v20 = vadd.f32 %v2288_v5, %v1640_v35 }
 0x23d   : > { %v1641_v61 = vpop.f32.mrf.mxu2 }
 0x23e   : > { %v1642_v45 = vadd.f32 %v3807_v17, %v1641_v61 }
 0x240   : > { %v1754_v37 = vadd.f32 %v2289_v29, %v1642_v45 }
 0x242   : > { %v2363_v30 = vpack.c.bf16 %v1754_v37, %v1753_v20 }
 0x244   : > { %2414 = vst [vmem:[%s3845_s8 + $0x50] sm:$0xff] %v2363_v30  }
 0x245   : > { %v1644_v46 = vpop.f32.mrf.mxu2 }
 0x246   : > { %v1645_v27 = vadd.f32 %v3807_v17, %v1644_v46 }
 0x248   : > { %v1755_v32 = vadd.f32 %v2292_v1, %v1645_v27 }
 0x24d   : > { %v1646_v18 = vpop.f32.mrf.mxu2 }
 0x24e   : > { %v1647_v9 = vadd.f32 %v3807_v17, %v1646_v18 }
 0x250   : > { %v1756_v58 = vadd.f32 %v2293_v22, %v1647_v9 }
 0x252   : > { %v2368_v51 = vpack.c.bf16 %v1756_v58, %v1755_v32 }
 0x254   : > { %2415 = vst [vmem:[%s3845_s8 + $0x58] sm:$0xff] %v2368_v51  }
 0x255   : > { %2816 = shalt.err (!%p2813_p3)
}
 0x256   : > { %s2891_s4 = smov 64   ;;  %s2892_s13 = smov 4  }
 0x257   : > { %2456 = dma.vmem_to_hbm [thread:$0]  (%p3010_p7), %s1845_s2, 2048, %s1847_s23, %s1830_s24, %s2891_s4, %s2891_s4, %s2892_s13  }
 0x258 PF: > { %s1861_s15 = sand.u32 1, %s2863_s21   ;;  %p2473_p5 = pnand %p1993_p11, %p2973_p6 }
 0x259   : > { %s1862_s16 = scalar_lea.sflag [#allocation4], %s1861_s15 }
 0x25a   : > { %p2474_p9 = pneg %p2473_p5 }
 0x25c   : > { %2858 = dma.done.wait (%p2474_p9), %s1862_s16, 2048  }
 0x25d   : > { %2860 = vsyncadd (%p2474_p9), %s1862_s16, 4294965248  ;;  %s26_s26 = sadd.s32 1, %s2883_s26   ;;  %s4083_s19 = sld [smem:[#allocation16_spill]] }
 0x25e   : > { %p23_p2 = scmp.ge.s32.totalorder %s26_s26, 4   ;;  %s4084_s23 = sld [smem:[#allocation20_spill]] }
 0x25f   : > { %s4085_s24 = sld [smem:[#allocation17_spill]]  ;;  %s4087_s21 = smov %s2867_s22 }
 0x260   : > { %s4086_s25 = sld [smem:[#allocation19_spill]]  ;;  %25 = sbr.rel (!%p23_p2) target bundleno = 12 (0xc), region = 113 }
 0x263   : > { %s4088_s22 = smov %s4083_s19 }
 0x265   :  { %1868 = vsyncpa [#allocation3], 1 }
 0x266   :  { %1870 = vsyncpa [#allocation3 + $0x1], 1 }
 0x267   :  { %1871 = vsyncpa [#allocation6], 1 }
 0x268   :  { %1873 = vsyncpa [#allocation6 + $0x1], 1 }
 0x269   :  { %1874 = vsyncpa [#allocation9], 1 }
 0x26a   :  { %1875 = vsyncpa [#allocation4], 1 }
 0x26b   :  { %1877 = vsyncpa [#allocation4 + $0x1], 1 }

</bundles_post_ra>
